<compile_context>
chip_gen: v5e
topology: v5e:2x2
jax: 0.10.0
libtpu: 0.0.40
codegen_flags: <defaults>
</compile_context>

<pallas_src>
import functools
import math

import jax
import jax.numpy as jnp
from jax import lax
from jax.experimental import pallas as pl
from jax.experimental.pallas import tpu as pltpu


def _supports_pipeline_mode():
    # pl.Buffered(1) single-buffers constant-index blocks (frees VMEM, esp. on v7x's 64 MiB).
    try:
        pl.BlockSpec((8, 128), lambda i: (0, 0), pipeline_mode=pl.Buffered(1))
        return True
    except Exception:
        return False


_PIPELINE_MODE_OK = _supports_pipeline_mode()


def _tpu_vmem_capacity_bytes():
    try:
        return int(pltpu.get_tpu_info().vmem_capacity_bytes)
    except Exception:
        return None


def _layernorm(x, gamma, beta, eps=1e-5):
    # x: (TQ, D), gamma/beta: (1, D); all f32.
    mu = jnp.mean(x, axis=-1, keepdims=True)
    var = jnp.mean((x - mu) ** 2, axis=-1, keepdims=True)
    return (x - mu) * lax.rsqrt(var + eps) * gamma + beta


def transformer_block_kernel(
    xc_ref, xf_ref,
    wq_ref, bq_ref, wk_ref, bk_ref, wv_ref, bv_ref, wo_ref, bo_ref,
    g1_ref, be1_ref,
    w1_ref, b1_ref, w2_ref, b2_ref,
    g2_ref, be2_ref,
    out_ref, attn_ref,
    acc_ref, kc_ref, vc_ref,
    *, tq, approx_recip,
):
    qi = pl.program_id(1)
    h = pl.program_id(2)
    num_h = pl.num_programs(2)
    cdt = xc_ref.dtype                      # matmul compute dtype (bf16 or f32), host-cast

    @pl.when(h == 0)
    def _():
        acc_ref[...] = jnp.zeros_like(acc_ref)

    # K/V projection for this head: computed once per (batch, head) on the first query tile,
    # cached in VMEM (compute_dtype) and reused by all later query tiles of the same batch.
    # Correctness requires the q-tile grid axis to be sequential per core ("arbitrary").
    @pl.when(qi == 0)
    def _():
        x_full = xc_ref[0]                                                         # (S, D)
        k = jnp.dot(x_full, wk_ref[0], preferred_element_type=jnp.float32) + bk_ref[0]
        v = jnp.dot(x_full, wv_ref[0], preferred_element_type=jnp.float32) + bv_ref[0]
        kc_ref[h] = k.astype(cdt)
        vc_ref[h] = v.astype(cdt)

    k_c = kc_ref[h]                                                                # (S, dk)
    v_c = vc_ref[h]                                                                # (S, dk)

    if tq == xc_ref.shape[1]:                                  # single query tile
        x_q = xc_ref[0]                                        # (TQ, D), compute dtype
    else:
        q_start = pl.multiple_of(qi * tq, tq)
        x_q = xc_ref[0, pl.ds(q_start, tq), :]                 # (TQ, D), compute dtype

    # 1/sqrt(d_k) is folded into W_q/b_q on the host; f32 MXU accumulation.
    q = jnp.dot(x_q, wq_ref[0], preferred_element_type=jnp.float32) + bq_ref[0]    # (TQ, dk)

    # scores = q @ k^T without an explicit XLU transpose (contract last dims of both).
    scores = lax.dot_general(
        q.astype(cdt), k_c,
        dimension_numbers=(((1,), (1,)), ((), ())),
        preferred_element_type=jnp.float32)                                        # (TQ, S)

    # --- softmax (f32), single live probability tensor, divide via EUP reciprocal ---
    p = jnp.exp(scores - jnp.max(scores, axis=-1, keepdims=True))
    p = p * pl.reciprocal(jnp.sum(p, axis=-1, keepdims=True), approx=approx_recip)
    p_c = p.astype(cdt)                                       # one cast, reused below
    if attn_ref.dtype == cdt:
        attn_ref[0, 0] = p_c
    else:
        attn_ref[0, 0] = p.astype(attn_ref.dtype)

    # --- head context, then this head's slice of W_o; accumulate into (TQ, D) scratch ---
    ctx = jnp.dot(p_c, v_c, preferred_element_type=jnp.float32)                    # (TQ, dk)
    acc_ref[...] += jnp.dot(ctx.astype(cdt), wo_ref[0],
                            preferred_element_type=jnp.float32)                    # (TQ, D)

    # --- finalize once all heads are accumulated: residual + LN1 + FFN + residual + LN2 ---
    @pl.when(h == num_h - 1)
    def _():
        attn_out = acc_ref[...] + bo_ref[...]
        h1 = _layernorm(xf_ref[0] + attn_out, g1_ref[...], be1_ref[...])           # f32 residual
        ff = jnp.maximum(
            jnp.dot(h1.astype(cdt), w1_ref[...],
                    preferred_element_type=jnp.float32) + b1_ref[...], 0.0)
        y = jnp.dot(ff.astype(cdt), w2_ref[...],
                    preferred_element_type=jnp.float32) + b2_ref[...]
        out_ref[0] = _layernorm(h1 + y, g2_ref[...], be2_ref[...]).astype(out_ref.dtype)


def transformer_block(x, params, *, num_heads, compute_dtype=jnp.bfloat16, attn_dtype=None):
    B, S, D = x.shape
    assert D % num_heads == 0
    d_k = D // num_heads
    Dff = params["w1"].shape[1]
    cdt = jnp.dtype(compute_dtype)
    attn_dtype = cdt if attn_dtype is None else jnp.dtype(attn_dtype)
    approx_recip = bool(cdt != jnp.dtype(jnp.float32))   # exact reciprocal on the f32 path

    # Per-generation sizing: v5e/v6e have 128 MiB VMEM (bigger q tiles, higher limit);
    # v7x has 64 MiB (keep TQ=128 and leave headroom).
    cap = _tpu_vmem_capacity_bytes()
    vmem_limit = 64 * 1024 * 1024 if cap is None else min(int(cap * 0.85), 112 * 1024 * 1024)
    if S <= 128:
        TQ = S
    elif cap is not None and cap >= 100 * 1024 * 1024 and S % 256 == 0:
        TQ = 256
    else:
        TQ = 128
    assert S % TQ == 0, "S must be a multiple of the query tile"
    n_qt = S // TQ

    # Host-side weight re-layout (done once): per-head slices become a leading axis indexed by
    # the grid; 1/sqrt(d_k) is folded into W_q/b_q; matmul weights and x are host-cast.
    inv = 1.0 / math.sqrt(d_k)
    wq_r = (params["wq"] * inv).reshape(D, num_heads, d_k).transpose(1, 0, 2).astype(cdt)
    wk_r = params["wk"].reshape(D, num_heads, d_k).transpose(1, 0, 2).astype(cdt)
    wv_r = params["wv"].reshape(D, num_heads, d_k).transpose(1, 0, 2).astype(cdt)
    wo_r = params["wo"].reshape(num_heads, d_k, D).astype(cdt)                      # (H, dk, D)
    bq_r = (params["bq"] * inv).reshape(num_heads, 1, d_k)                          # f32
    bk_r = params["bk"].reshape(num_heads, 1, d_k)
    bv_r = params["bv"].reshape(num_heads, 1, d_k)
    w1 = params["w1"].astype(cdt)
    w2 = params["w2"].astype(cdt)
    x_c = x.astype(cdt)                                                             # K/V/Q source

    itemsize = cdt.itemsize
    flops = B * (8 * S * D * D + 4 * S * S * D + 4 * S * D * Dff)
    bytes_accessed = (B * S * D * (4 + itemsize)              # x (f32 tile view + cdt view)
                      + 4 * B * S * D                         # output (f32)
                      + attn_dtype.itemsize * B * num_heads * S * S
                      + (4 * D * D + 2 * D * Dff) * itemsize)
    cost = pl.CostEstimate(flops=flops,
                           transcendentals=B * num_heads * S * S,
                           bytes_accessed=bytes_accessed)

    kernel = functools.partial(transformer_block_kernel, tq=TQ, approx_recip=approx_recip)
    args = [x_c, x, wq_r, bq_r, wk_r, bk_r, wv_r, bv_r, wo_r, params["bo"],
            params["g1"], params["be1"], w1, params["b1"], w2, params["b2"],
            params["g2"], params["be2"]]

    def run(single_buffer_consts):
        def const(shape):
            zeros = (0,) * len(shape)
            imap = lambda b, q, h, _z=zeros: _z
            if single_buffer_consts:
                return pl.BlockSpec(shape, imap, pipeline_mode=pl.Buffered(1))
            return pl.BlockSpec(shape, imap)

        head_w = lambda: pl.BlockSpec((1, D, d_k), lambda b, q, h: (h, 0, 0))
        head_b = lambda: pl.BlockSpec((1, 1, d_k), lambda b, q, h: (h, 0, 0))

        in_specs = [
            pl.BlockSpec((1, S, D), lambda b, q, h: (b, 0, 0)),    # x (compute dtype, full seq)
            pl.BlockSpec((1, TQ, D), lambda b, q, h: (b, q, 0)),   # x (f32 residual/LN tile)
            head_w(), head_b(),                                    # Wq, bq (scaled)
            head_w(), head_b(),                                    # Wk, bk
            head_w(), head_b(),                                    # Wv, bv
            pl.BlockSpec((1, d_k, D), lambda b, q, h: (h, 0, 0)),  # Wo per-head slice
            const((1, D)),                                         # bo
            const((1, D)), const((1, D)),                          # gamma1, beta1
            const((D, Dff)), const((1, Dff)),                      # W1, b1
            const((Dff, D)), const((1, D)),                        # W2, b2
            const((1, D)), const((1, D)),                          # gamma2, beta2
        ]
        out_specs = [
            pl.BlockSpec((1, TQ, D), lambda b, q, h: (b, q, 0)),
            pl.BlockSpec((1, 1, TQ, S), lambda b, q, h: (b, h, q, 0)),
        ]
        out_shape = [
            jax.ShapeDtypeStruct((B, S, D), jnp.float32),
            jax.ShapeDtypeStruct((B, num_heads, S, S), attn_dtype),
        ]
        f = pl.pallas_call(
            kernel,
            out_shape=out_shape,
            grid_spec=pltpu.PrefetchScalarGridSpec(
                num_scalar_prefetch=0,
                grid=(B, n_qt, num_heads),                   # heads (reduction) axis last
                in_specs=in_specs,
                out_specs=out_specs,
                scratch_shapes=[
                    pltpu.VMEM((TQ, D), jnp.float32),        # per-tile W_o accumulator
                    pltpu.VMEM((num_heads, S, d_k), cdt),    # K cache (per batch)
                    pltpu.VMEM((num_heads, S, d_k), cdt),    # V cache (per batch)
                ],
            ),
            compiler_params=pltpu.CompilerParams(
                # q-tile axis must be sequential per core: the K/V cache written at qi==0 is
                # reused by later q tiles of the same batch.  Batch axis carries parallelism.
                dimension_semantics=("parallel", "arbitrary", "arbitrary"),
                vmem_limit_bytes=vmem_limit,
            ),
            cost_estimate=cost,
        )
        return f(*args)

    if _PIPELINE_MODE_OK:
        try:
            return run(True)
        except Exception:
            pass  # fall back to default (double-buffered) constant blocks
    return run(False)


def make_params(key, d_model, d_ff):
    ks = jax.random.split(key, 10)
    scale = 0.02
    return {
        "wq": scale * jax.random.normal(ks[0], (d_model, d_model), jnp.float32),
        "bq": jnp.zeros((1, d_model), jnp.float32),
        "wk": scale * jax.random.normal(ks[1], (d_model, d_model), jnp.float32),
        "bk": jnp.zeros((1, d_model), jnp.float32),
        "wv": scale * jax.random.normal(ks[2], (d_model, d_model), jnp.float32),
        "bv": jnp.zeros((1, d_model), jnp.float32),
        "wo": scale * jax.random.normal(ks[3], (d_model, d_model), jnp.float32),
        "bo": jnp.zeros((1, d_model), jnp.float32),
        "g1": jnp.ones((1, d_model), jnp.float32),
        "be1": jnp.zeros((1, d_model), jnp.float32),
        "w1": scale * jax.random.normal(ks[4], (d_model, d_ff), jnp.float32),
        "b1": jnp.zeros((1, d_ff), jnp.float32),
        "w2": scale * jax.random.normal(ks[5], (d_ff, d_model), jnp.float32),
        "b2": jnp.zeros((1, d_model), jnp.float32),
        "g2": jnp.ones((1, d_model), jnp.float32),
        "be2": jnp.zeros((1, d_model), jnp.float32),
    }


def reference_block(x, p, num_heads):
    # Plain-JAX reference (dropout = identity), f32 throughout.
    B, S, D = x.shape
    d_k = D // num_heads

    def ln(h, g, b, eps=1e-5):
        mu = jnp.mean(h, axis=-1, keepdims=True)
        var = jnp.mean((h - mu) ** 2, axis=-1, keepdims=True)
        return (h - mu) / jnp.sqrt(var + eps) * g + b

    q = x @ p["wq"] + p["bq"]
    k = x @ p["wk"] + p["bk"]
    v = x @ p["wv"] + p["bv"]
    q = q.reshape(B, S, num_heads, d_k).transpose(0, 2, 1, 3)
    k = k.reshape(B, S, num_heads, d_k).transpose(0, 2, 1, 3)
    v = v.reshape(B, S, num_heads, d_k).transpose(0, 2, 1, 3)
    scores = jnp.einsum("bhqd,bhkd->bhqk", q, k) / math.sqrt(d_k)
    w = jax.nn.softmax(scores, axis=-1)
    ao = jnp.einsum("bhqk,bhkd->bhqd", w, v).transpose(0, 2, 1, 3).reshape(B, S, D)
    ao = ao @ p["wo"] + p["bo"]
    h1 = ln(x + ao, p["g1"], p["be1"])
    ff = jnp.maximum(h1 @ p["w1"] + p["b1"], 0.0) @ p["w2"] + p["b2"]
    return ln(h1 + ff, p["g2"], p["be2"]), w


if __name__ == "__main__":
    B, S, D, H, Dff = 2, 8, 32, 4, 64
    key = jax.random.PRNGKey(0)
    kx, kp = jax.random.split(key)
    x = jax.random.normal(kx, (B, S, D), jnp.float32)
    params = make_params(kp, D, Dff)

    ref_out, ref_attn = reference_block(x, params, H)

    # Full-precision path (exact reciprocal, f32 attention output): tight correctness check.
    out, attn = transformer_block(x, params, num_heads=H, compute_dtype=jnp.float32)
    out = jax.block_until_ready(out)
    attn = jax.block_until_ready(attn)
    assert jnp.allclose(out, ref_out, atol=1e-3, rtol=1e-3)
    assert jnp.allclose(attn, ref_attn, atol=1e-4, rtol=1e-4)

    # bf16 MXU + bf16 attention-weight writeback (performance configuration): loose check.
    out16, attn16 = transformer_block(x, params, num_heads=H, compute_dtype=jnp.bfloat16)
    out16 = jax.block_until_ready(out16)
    attn16 = jax.block_until_ready(attn16)
    assert jnp.allclose(out16, ref_out, atol=1e-1, rtol=1e-1)
    assert jnp.allclose(attn16.astype(jnp.float32), ref_attn, atol=3e-2, rtol=3e-2)

    print("KERNEL_OK")
</pallas_src>

<mosaic_0001>
module attributes {stable_mosaic.version = 11 : i64} {
  func.func @transformer_block_kernel(%arg0: i32, %arg1: i32, %arg2: i32, %arg3: memref<1x8x32xf32, #tpu.memory_space<vmem>>, %arg4: memref<1x8x32xf32, #tpu.memory_space<vmem>>, %arg5: memref<1x32x8xf32, #tpu.memory_space<vmem>>, %arg6: memref<1x1x8xf32, #tpu.memory_space<vmem>>, %arg7: memref<1x32x8xf32, #tpu.memory_space<vmem>>, %arg8: memref<1x1x8xf32, #tpu.memory_space<vmem>>, %arg9: memref<1x32x8xf32, #tpu.memory_space<vmem>>, %arg10: memref<1x1x8xf32, #tpu.memory_space<vmem>>, %arg11: memref<1x8x32xf32, #tpu.memory_space<vmem>>, %arg12: memref<1x32xf32, #tpu.memory_space<vmem>>, %arg13: memref<1x32xf32, #tpu.memory_space<vmem>>, %arg14: memref<1x32xf32, #tpu.memory_space<vmem>>, %arg15: memref<32x64xf32, #tpu.memory_space<vmem>>, %arg16: memref<1x64xf32, #tpu.memory_space<vmem>>, %arg17: memref<64x32xf32, #tpu.memory_space<vmem>>, %arg18: memref<1x32xf32, #tpu.memory_space<vmem>>, %arg19: memref<1x32xf32, #tpu.memory_space<vmem>>, %arg20: memref<1x32xf32, #tpu.memory_space<vmem>>, %arg21: memref<1x8x32xf32, #tpu.memory_space<vmem>>, %arg22: memref<1x1x8x8xf32, #tpu.memory_space<vmem>>, %arg23: memref<8x32xf32, #tpu.memory_space<vmem>>, %arg24: memref<4x8x8xf32, #tpu.memory_space<vmem>>, %arg25: memref<4x8x8xf32, #tpu.memory_space<vmem>>) attributes {dimension_semantics = [#tpu.dimension_semantics<parallel>, #tpu.dimension_semantics<arbitrary>, #tpu.dimension_semantics<arbitrary>], iteration_bounds = array<i64: 2, 1, 4>, scalar_prefetch = 0 : i64, scratch_operands = 3 : i64, tpu.core_type = #tpu.core_type<tc>, window_params = [{transform_indices = @transform_0, window_bounds = array<i64: 1, 8, 32>}, {transform_indices = @transform_1, window_bounds = array<i64: 1, 8, 32>}, {transform_indices = @transform_2, window_bounds = array<i64: 1, 32, 8>}, {transform_indices = @transform_3, window_bounds = array<i64: 1, 1, 8>}, {transform_indices = @transform_4, window_bounds = array<i64: 1, 32, 8>}, {transform_indices = @transform_5, window_bounds = array<i64: 1, 1, 8>}, {transform_indices = @transform_6, window_bounds = array<i64: 1, 32, 8>}, {transform_indices = @transform_7, window_bounds = array<i64: 1, 1, 8>}, {transform_indices = @transform_8, window_bounds = array<i64: 1, 8, 32>}, {pipeline_mode = #tpu.pipeline_mode<synchronous>, transform_indices = @transform_9, window_bounds = array<i64: 1, 32>}, {pipeline_mode = #tpu.pipeline_mode<synchronous>, transform_indices = @transform_10, window_bounds = array<i64: 1, 32>}, {pipeline_mode = #tpu.pipeline_mode<synchronous>, transform_indices = @transform_11, window_bounds = array<i64: 1, 32>}, {pipeline_mode = #tpu.pipeline_mode<synchronous>, transform_indices = @transform_12, window_bounds = array<i64: 32, 64>}, {pipeline_mode = #tpu.pipeline_mode<synchronous>, transform_indices = @transform_13, window_bounds = array<i64: 1, 64>}, {pipeline_mode = #tpu.pipeline_mode<synchronous>, transform_indices = @transform_14, window_bounds = array<i64: 64, 32>}, {pipeline_mode = #tpu.pipeline_mode<synchronous>, transform_indices = @transform_15, window_bounds = array<i64: 1, 32>}, {pipeline_mode = #tpu.pipeline_mode<synchronous>, transform_indices = @transform_16, window_bounds = array<i64: 1, 32>}, {pipeline_mode = #tpu.pipeline_mode<synchronous>, transform_indices = @transform_17, window_bounds = array<i64: 1, 32>}, {transform_indices = @transform_18, window_bounds = array<i64: 1, 8, 32>}, {transform_indices = @transform_19, window_bounds = array<i64: 1, 1, 8, 8>}]} {
    %c0_i32 = arith.constant 0 : i32
    %0 = arith.cmpi eq, %arg2, %c0_i32 : i32
    %1 = arith.extui %0 : i1 to i32
    %c0_i32_0 = arith.constant 0 : i32
    %2 = arith.cmpi ne, %1, %c0_i32_0 : i32
    scf.if %2 {
      %cst_32 = arith.constant 0.000000e+00 : f32
      %45 = vector.broadcast %cst_32 : f32 to vector<8x32xf32>
      %c0_33 = arith.constant 0 : index
      %c0_34 = arith.constant 0 : index
      %46 = vector.load %arg23[%c0_33, %c0_34] : memref<8x32xf32, #tpu.memory_space<vmem>>, vector<8x32xf32>
      tpu.vector_store %arg23[%c0_33, %c0_34], %45 {strides = array<i32>} : memref<8x32xf32, #tpu.memory_space<vmem>>, vector<8x32xf32>,
    } else {
    }
    %c0_i32_1 = arith.constant 0 : i32
    %3 = arith.cmpi eq, %arg1, %c0_i32_1 : i32
    %4 = arith.extui %3 : i1 to i32
    %c0_i32_2 = arith.constant 0 : i32
    %5 = arith.cmpi ne, %4, %c0_i32_2 : i32
    scf.if %5 {
      %c0_32 = arith.constant 0 : index
      %c0_33 = arith.constant 0 : index
      %c0_34 = arith.constant 0 : index
      %45 = vector.load %arg3[%c0_32, %c0_33, %c0_34] : memref<1x8x32xf32, #tpu.memory_space<vmem>>, vector<1x8x32xf32>
      %46 = vector.shape_cast %45 : vector<1x8x32xf32> to vector<8x32xf32>
      %c0_35 = arith.constant 0 : index
      %c0_36 = arith.constant 0 : index
      %c0_37 = arith.constant 0 : index
      %47 = vector.load %arg7[%c0_35, %c0_36, %c0_37] : memref<1x32x8xf32, #tpu.memory_space<vmem>>, vector<1x32x8xf32>
      %48 = vector.shape_cast %47 : vector<1x32x8xf32> to vector<32x8xf32>
      %cst_38 = arith.constant dense<0.000000e+00> : vector<8x8xf32>
      %49 = tpu.matmul %46, %48, %cst_38 {dimension_numbers = #tpu.dot_dimension_numbers<[1], [0], [0], [1], [0, 0, 1, 1], [], []>} : vector<8x32xf32>, vector<32x8xf32>, vector<8x8xf32> -> vector<8x8xf32>
      %c0_39 = arith.constant 0 : index
      %c0_40 = arith.constant 0 : index
      %c0_41 = arith.constant 0 : index
      %50 = vector.load %arg8[%c0_39, %c0_40, %c0_41] : memref<1x1x8xf32, #tpu.memory_space<vmem>>, vector<1x1x8xf32>
      %51 = vector.shape_cast %50 : vector<1x1x8xf32> to vector<1x8xf32>
      %52 = vector.broadcast %51 : vector<1x8xf32> to vector<8x8xf32>
      %53 = arith.addf %49, %52 : vector<8x8xf32>
      %c0_42 = arith.constant 0 : index
      %c0_43 = arith.constant 0 : index
      %c0_44 = arith.constant 0 : index
      %54 = vector.load %arg9[%c0_42, %c0_43, %c0_44] : memref<1x32x8xf32, #tpu.memory_space<vmem>>, vector<1x32x8xf32>
      %55 = vector.shape_cast %54 : vector<1x32x8xf32> to vector<32x8xf32>
      %cst_45 = arith.constant dense<0.000000e+00> : vector<8x8xf32>
      %56 = tpu.matmul %46, %55, %cst_45 {dimension_numbers = #tpu.dot_dimension_numbers<[1], [0], [0], [1], [0, 0, 1, 1], [], []>} : vector<8x32xf32>, vector<32x8xf32>, vector<8x8xf32> -> vector<8x8xf32>
      %c0_46 = arith.constant 0 : index
      %c0_47 = arith.constant 0 : index
      %c0_48 = arith.constant 0 : index
      %57 = vector.load %arg10[%c0_46, %c0_47, %c0_48] : memref<1x1x8xf32, #tpu.memory_space<vmem>>, vector<1x1x8xf32>
      %58 = vector.shape_cast %57 : vector<1x1x8xf32> to vector<1x8xf32>
      %59 = vector.broadcast %58 : vector<1x8xf32> to vector<8x8xf32>
      %60 = arith.addf %56, %59 : vector<8x8xf32>
      %61 = arith.index_cast %arg2 : i32 to index
      %c0_49 = arith.constant 0 : index
      %c0_50 = arith.constant 0 : index
      %62 = vector.load %arg24[%61, %c0_49, %c0_50] : memref<4x8x8xf32, #tpu.memory_space<vmem>>, vector<1x8x8xf32>
      %63 = vector.shape_cast %62 : vector<1x8x8xf32> to vector<8x8xf32>
      %64 = vector.shape_cast %53 : vector<8x8xf32> to vector<1x8x8xf32>
      tpu.vector_store %arg24[%61, %c0_49, %c0_50], %64 {strides = array<i32>} : memref<4x8x8xf32, #tpu.memory_space<vmem>>, vector<1x8x8xf32>,
      %65 = arith.index_cast %arg2 : i32 to index
      %c0_51 = arith.constant 0 : index
      %c0_52 = arith.constant 0 : index
      %66 = vector.load %arg25[%65, %c0_51, %c0_52] : memref<4x8x8xf32, #tpu.memory_space<vmem>>, vector<1x8x8xf32>
      %67 = vector.shape_cast %66 : vector<1x8x8xf32> to vector<8x8xf32>
      %68 = vector.shape_cast %60 : vector<8x8xf32> to vector<1x8x8xf32>
      tpu.vector_store %arg25[%65, %c0_51, %c0_52], %68 {strides = array<i32>} : memref<4x8x8xf32, #tpu.memory_space<vmem>>, vector<1x8x8xf32>,
    } else {
    }
    %6 = arith.index_cast %arg2 : i32 to index
    %c0 = arith.constant 0 : index
    %c0_3 = arith.constant 0 : index
    %7 = vector.load %arg24[%6, %c0, %c0_3] : memref<4x8x8xf32, #tpu.memory_space<vmem>>, vector<1x8x8xf32>
    %8 = vector.shape_cast %7 : vector<1x8x8xf32> to vector<8x8xf32>
    %9 = arith.index_cast %arg2 : i32 to index
    %c0_4 = arith.constant 0 : index
    %c0_5 = arith.constant 0 : index
    %10 = vector.load %arg25[%9, %c0_4, %c0_5] : memref<4x8x8xf32, #tpu.memory_space<vmem>>, vector<1x8x8xf32>
    %11 = vector.shape_cast %10 : vector<1x8x8xf32> to vector<8x8xf32>
    %c0_6 = arith.constant 0 : index
    %c0_7 = arith.constant 0 : index
    %c0_8 = arith.constant 0 : index
    %12 = vector.load %arg3[%c0_6, %c0_7, %c0_8] : memref<1x8x32xf32, #tpu.memory_space<vmem>>, vector<1x8x32xf32>
    %13 = vector.shape_cast %12 : vector<1x8x32xf32> to vector<8x32xf32>
    %c0_9 = arith.constant 0 : index
    %c0_10 = arith.constant 0 : index
    %c0_11 = arith.constant 0 : index
    %14 = vector.load %arg5[%c0_9, %c0_10, %c0_11] : memref<1x32x8xf32, #tpu.memory_space<vmem>>, vector<1x32x8xf32>
    %15 = vector.shape_cast %14 : vector<1x32x8xf32> to vector<32x8xf32>
    %cst = arith.constant dense<0.000000e+00> : vector<8x8xf32>
    %16 = tpu.matmul %13, %15, %cst {dimension_numbers = #tpu.dot_dimension_numbers<[1], [0], [0], [1], [0, 0, 1, 1], [], []>} : vector<8x32xf32>, vector<32x8xf32>, vector<8x8xf32> -> vector<8x8xf32>
    %c0_12 = arith.constant 0 : index
    %c0_13 = arith.constant 0 : index
    %c0_14 = arith.constant 0 : index
    %17 = vector.load %arg6[%c0_12, %c0_13, %c0_14] : memref<1x1x8xf32, #tpu.memory_space<vmem>>, vector<1x1x8xf32>
    %18 = vector.shape_cast %17 : vector<1x1x8xf32> to vector<1x8xf32>
    %19 = vector.broadcast %18 : vector<1x8xf32> to vector<8x8xf32>
    %20 = arith.addf %16, %19 : vector<8x8xf32>
    %cst_15 = arith.constant dense<0.000000e+00> : vector<8x8xf32>
    %21 = tpu.matmul %20, %8, %cst_15 {dimension_numbers = #tpu.dot_dimension_numbers<[1], [1], [0], [0], [0, 0, 1, 0], [], []>} : vector<8x8xf32>, vector<8x8xf32>, vector<8x8xf32> -> vector<8x8xf32>
    %cst_16 = arith.constant dense<0xFF800000> : vector<8xf32>
    %22 = vector.multi_reduction <maximumf>, %21, %cst_16 [1] : vector<8x8xf32> to vector<8xf32>
    %23 = vector.shape_cast %22 : vector<8xf32> to vector<8x1xf32>
    %24 = vector.broadcast %23 : vector<8x1xf32> to vector<8x8xf32>
    %25 = arith.subf %21, %24 : vector<8x8xf32>
    %26 = math.exp %25 : vector<8x8xf32>
    %cst_17 = arith.constant dense<0.000000e+00> : vector<8xf32>
    %27 = vector.multi_reduction <add>, %26, %cst_17 [1] : vector<8x8xf32> to vector<8xf32>
    %28 = vector.shape_cast %27 : vector<8xf32> to vector<8x1xf32>
    %29 = tpu.reciprocal %28 : vector<8x1xf32> -> vector<8x1xf32>
    %30 = vector.broadcast %29 : vector<8x1xf32> to vector<8x8xf32>
    %31 = arith.mulf %26, %30 : vector<8x8xf32>
    %c0_18 = arith.constant 0 : index
    %c0_19 = arith.constant 0 : index
    %c0_20 = arith.constant 0 : index
    %c0_21 = arith.constant 0 : index
    %32 = vector.load %arg22[%c0_18, %c0_19, %c0_20, %c0_21] : memref<1x1x8x8xf32, #tpu.memory_space<vmem>>, vector<1x1x8x8xf32>
    %33 = vector.shape_cast %32 : vector<1x1x8x8xf32> to vector<8x8xf32>
    %34 = vector.shape_cast %31 : vector<8x8xf32> to vector<1x1x8x8xf32>
    tpu.vector_store %arg22[%c0_18, %c0_19, %c0_20, %c0_21], %34 {strides = array<i32>} : memref<1x1x8x8xf32, #tpu.memory_space<vmem>>, vector<1x1x8x8xf32>,
    %cst_22 = arith.constant dense<0.000000e+00> : vector<8x8xf32>
    %35 = tpu.matmul %31, %11, %cst_22 {dimension_numbers = #tpu.dot_dimension_numbers<[1], [0], [0], [1], [0, 0, 1, 1], [], []>} : vector<8x8xf32>, vector<8x8xf32>, vector<8x8xf32> -> vector<8x8xf32>
    %c0_23 = arith.constant 0 : index
    %c0_24 = arith.constant 0 : index
    %36 = vector.load %arg23[%c0_23, %c0_24] : memref<8x32xf32, #tpu.memory_space<vmem>>, vector<8x32xf32>
    %c0_25 = arith.constant 0 : index
    %c0_26 = arith.constant 0 : index
    %c0_27 = arith.constant 0 : index
    %37 = vector.load %arg11[%c0_25, %c0_26, %c0_27] : memref<1x8x32xf32, #tpu.memory_space<vmem>>, vector<1x8x32xf32>
    %38 = vector.shape_cast %37 : vector<1x8x32xf32> to vector<8x32xf32>
    %cst_28 = arith.constant dense<0.000000e+00> : vector<8x32xf32>
    %39 = tpu.matmul %35, %38, %cst_28 {dimension_numbers = #tpu.dot_dimension_numbers<[1], [0], [0], [1], [0, 0, 1, 1], [], []>} : vector<8x8xf32>, vector<8x32xf32>, vector<8x32xf32> -> vector<8x32xf32>
    %40 = arith.addf %36, %39 : vector<8x32xf32>
    %c0_29 = arith.constant 0 : index
    %c0_30 = arith.constant 0 : index
    %41 = vector.load %arg23[%c0_29, %c0_30] : memref<8x32xf32, #tpu.memory_space<vmem>>, vector<8x32xf32>
    tpu.vector_store %arg23[%c0_29, %c0_30], %40 {strides = array<i32>} : memref<8x32xf32, #tpu.memory_space<vmem>>, vector<8x32xf32>,
    %c3_i32 = arith.constant 3 : i32
    %42 = arith.cmpi eq, %arg2, %c3_i32 : i32
    %43 = arith.extui %42 : i1 to i32
    %c0_i32_31 = arith.constant 0 : i32
    %44 = arith.cmpi ne, %43, %c0_i32_31 : i32
    scf.if %44 {
      %c0_32 = arith.constant 0 : index
      %c0_33 = arith.constant 0 : index
      %45 = vector.load %arg23[%c0_32, %c0_33] : memref<8x32xf32, #tpu.memory_space<vmem>>, vector<8x32xf32>
      %c0_34 = arith.constant 0 : index
      %c0_35 = arith.constant 0 : index
      %46 = vector.load %arg12[%c0_34, %c0_35] : memref<1x32xf32, #tpu.memory_space<vmem>>, vector<1x32xf32>
      %47 = vector.broadcast %46 : vector<1x32xf32> to vector<8x32xf32>
      %48 = arith.addf %45, %47 : vector<8x32xf32>
      %c0_36 = arith.constant 0 : index
      %c0_37 = arith.constant 0 : index
      %c0_38 = arith.constant 0 : index
      %49 = vector.load %arg4[%c0_36, %c0_37, %c0_38] : memref<1x8x32xf32, #tpu.memory_space<vmem>>, vector<1x8x32xf32>
      %50 = vector.shape_cast %49 : vector<1x8x32xf32> to vector<8x32xf32>
      %51 = arith.addf %50, %48 : vector<8x32xf32>
      %c0_39 = arith.constant 0 : index
      %c0_40 = arith.constant 0 : index
      %52 = vector.load %arg13[%c0_39, %c0_40] : memref<1x32xf32, #tpu.memory_space<vmem>>, vector<1x32xf32>
      %c0_41 = arith.constant 0 : index
      %c0_42 = arith.constant 0 : index
      %53 = vector.load %arg14[%c0_41, %c0_42] : memref<1x32xf32, #tpu.memory_space<vmem>>, vector<1x32xf32>
      %cst_43 = arith.constant dense<0.000000e+00> : vector<8xf32>
      %54 = vector.multi_reduction <add>, %51, %cst_43 [1] : vector<8x32xf32> to vector<8xf32>
      %55 = vector.shape_cast %54 : vector<8xf32> to vector<8x1xf32>
      %cst_44 = arith.constant 3.200000e+01 : f32
      %56 = vector.broadcast %cst_44 : f32 to vector<8x1xf32>
      %57 = arith.divf %55, %56 : vector<8x1xf32>
      %58 = vector.broadcast %57 : vector<8x1xf32> to vector<8x32xf32>
      %59 = arith.subf %51, %58 : vector<8x32xf32>
      %60 = arith.mulf %59, %59 : vector<8x32xf32>
      %cst_45 = arith.constant dense<0.000000e+00> : vector<8xf32>
      %61 = vector.multi_reduction <add>, %60, %cst_45 [1] : vector<8x32xf32> to vector<8xf32>
      %62 = vector.shape_cast %61 : vector<8xf32> to vector<8x1xf32>
      %cst_46 = arith.constant 3.200000e+01 : f32
      %63 = vector.broadcast %cst_46 : f32 to vector<8x1xf32>
      %64 = arith.divf %62, %63 : vector<8x1xf32>
      %65 = vector.broadcast %57 : vector<8x1xf32> to vector<8x32xf32>
      %66 = arith.subf %51, %65 : vector<8x32xf32>
      %cst_47 = arith.constant 9.99999974E-6 : f32
      %67 = vector.broadcast %cst_47 : f32 to vector<8x1xf32>
      %68 = arith.addf %64, %67 : vector<8x1xf32>
      %69 = math.rsqrt %68 : vector<8x1xf32>
      %70 = vector.broadcast %69 : vector<8x1xf32> to vector<8x32xf32>
      %71 = arith.mulf %66, %70 : vector<8x32xf32>
      %72 = vector.broadcast %52 : vector<1x32xf32> to vector<8x32xf32>
      %73 = arith.mulf %71, %72 : vector<8x32xf32>
      %74 = vector.broadcast %53 : vector<1x32xf32> to vector<8x32xf32>
      %75 = arith.addf %73, %74 : vector<8x32xf32>
      %c0_48 = arith.constant 0 : index
      %c0_49 = arith.constant 0 : index
      %76 = vector.load %arg15[%c0_48, %c0_49] : memref<32x64xf32, #tpu.memory_space<vmem>>, vector<32x64xf32>
      %cst_50 = arith.constant dense<0.000000e+00> : vector<8x64xf32>
      %77 = tpu.matmul %75, %76, %cst_50 {dimension_numbers = #tpu.dot_dimension_numbers<[1], [0], [0], [1], [0, 0, 1, 1], [], []>} : vector<8x32xf32>, vector<32x64xf32>, vector<8x64xf32> -> vector<8x64xf32>
      %c0_51 = arith.constant 0 : index
      %c0_52 = arith.constant 0 : index
      %78 = vector.load %arg16[%c0_51, %c0_52] : memref<1x64xf32, #tpu.memory_space<vmem>>, vector<1x64xf32>
      %79 = vector.broadcast %78 : vector<1x64xf32> to vector<8x64xf32>
      %80 = arith.addf %77, %79 : vector<8x64xf32>
      %cst_53 = arith.constant 0.000000e+00 : f32
      %81 = vector.broadcast %cst_53 : f32 to vector<8x64xf32>
      %82 = arith.maximumf %80, %81 : vector<8x64xf32>
      %c0_54 = arith.constant 0 : index
      %c0_55 = arith.constant 0 : index
      %83 = vector.load %arg17[%c0_54, %c0_55] : memref<64x32xf32, #tpu.memory_space<vmem>>, vector<64x32xf32>
      %cst_56 = arith.constant dense<0.000000e+00> : vector<8x32xf32>
      %84 = tpu.matmul %82, %83, %cst_56 {dimension_numbers = #tpu.dot_dimension_numbers<[1], [0], [0], [1], [0, 0, 1, 1], [], []>} : vector<8x64xf32>, vector<64x32xf32>, vector<8x32xf32> -> vector<8x32xf32>
      %c0_57 = arith.constant 0 : index
      %c0_58 = arith.constant 0 : index
      %85 = vector.load %arg18[%c0_57, %c0_58] : memref<1x32xf32, #tpu.memory_space<vmem>>, vector<1x32xf32>
      %86 = vector.broadcast %85 : vector<1x32xf32> to vector<8x32xf32>
      %87 = arith.addf %84, %86 : vector<8x32xf32>
      %88 = arith.addf %75, %87 : vector<8x32xf32>
      %c0_59 = arith.constant 0 : index
      %c0_60 = arith.constant 0 : index
      %89 = vector.load %arg19[%c0_59, %c0_60] : memref<1x32xf32, #tpu.memory_space<vmem>>, vector<1x32xf32>
      %c0_61 = arith.constant 0 : index
      %c0_62 = arith.constant 0 : index
      %90 = vector.load %arg20[%c0_61, %c0_62] : memref<1x32xf32, #tpu.memory_space<vmem>>, vector<1x32xf32>
      %cst_63 = arith.constant dense<0.000000e+00> : vector<8xf32>
      %91 = vector.multi_reduction <add>, %88, %cst_63 [1] : vector<8x32xf32> to vector<8xf32>
      %92 = vector.shape_cast %91 : vector<8xf32> to vector<8x1xf32>
      %cst_64 = arith.constant 3.200000e+01 : f32
      %93 = vector.broadcast %cst_64 : f32 to vector<8x1xf32>
      %94 = arith.divf %92, %93 : vector<8x1xf32>
      %95 = vector.broadcast %94 : vector<8x1xf32> to vector<8x32xf32>
      %96 = arith.subf %88, %95 : vector<8x32xf32>
      %97 = arith.mulf %96, %96 : vector<8x32xf32>
      %cst_65 = arith.constant dense<0.000000e+00> : vector<8xf32>
      %98 = vector.multi_reduction <add>, %97, %cst_65 [1] : vector<8x32xf32> to vector<8xf32>
      %99 = vector.shape_cast %98 : vector<8xf32> to vector<8x1xf32>
      %cst_66 = arith.constant 3.200000e+01 : f32
      %100 = vector.broadcast %cst_66 : f32 to vector<8x1xf32>
      %101 = arith.divf %99, %100 : vector<8x1xf32>
      %102 = vector.broadcast %94 : vector<8x1xf32> to vector<8x32xf32>
      %103 = arith.subf %88, %102 : vector<8x32xf32>
      %cst_67 = arith.constant 9.99999974E-6 : f32
      %104 = vector.broadcast %cst_67 : f32 to vector<8x1xf32>
      %105 = arith.addf %101, %104 : vector<8x1xf32>
      %106 = math.rsqrt %105 : vector<8x1xf32>
      %107 = vector.broadcast %106 : vector<8x1xf32> to vector<8x32xf32>
      %108 = arith.mulf %103, %107 : vector<8x32xf32>
      %109 = vector.broadcast %89 : vector<1x32xf32> to vector<8x32xf32>
      %110 = arith.mulf %108, %109 : vector<8x32xf32>
      %111 = vector.broadcast %90 : vector<1x32xf32> to vector<8x32xf32>
      %112 = arith.addf %110, %111 : vector<8x32xf32>
      %c0_68 = arith.constant 0 : index
      %c0_69 = arith.constant 0 : index
      %c0_70 = arith.constant 0 : index
      %113 = vector.load %arg21[%c0_68, %c0_69, %c0_70] : memref<1x8x32xf32, #tpu.memory_space<vmem>>, vector<1x8x32xf32>
      %114 = vector.shape_cast %113 : vector<1x8x32xf32> to vector<8x32xf32>
      %115 = vector.shape_cast %112 : vector<8x32xf32> to vector<1x8x32xf32>
      tpu.vector_store %arg21[%c0_68, %c0_69, %c0_70], %115 {strides = array<i32>} : memref<1x8x32xf32, #tpu.memory_space<vmem>>, vector<1x8x32xf32>,
    } else {
    }
    return
  }
  func.func @transform_0(%arg0: i32, %arg1: i32, %arg2: i32) -> (i32, i32, i32) {
    %c0_i32 = arith.constant 0 : i32
    %c0_i32_0 = arith.constant 0 : i32
    %c0_i32_1 = arith.constant 0 : i32
    return %arg0, %c0_i32, %c0_i32_0 : i32, i32, i32
  }
  func.func @transform_1(%arg0: i32, %arg1: i32, %arg2: i32) -> (i32, i32, i32) {
    %c0_i32 = arith.constant 0 : i32
    %c0_i32_0 = arith.constant 0 : i32
    return %arg0, %arg1, %c0_i32 : i32, i32, i32
  }
  func.func @transform_2(%arg0: i32, %arg1: i32, %arg2: i32) -> (i32, i32, i32) {
    %c0_i32 = arith.constant 0 : i32
    %c0_i32_0 = arith.constant 0 : i32
    %c0_i32_1 = arith.constant 0 : i32
    return %arg2, %c0_i32, %c0_i32_0 : i32, i32, i32
  }
  func.func @transform_3(%arg0: i32, %arg1: i32, %arg2: i32) -> (i32, i32, i32) {
    %c0_i32 = arith.constant 0 : i32
    %c0_i32_0 = arith.constant 0 : i32
    %c0_i32_1 = arith.constant 0 : i32
    return %arg2, %c0_i32, %c0_i32_0 : i32, i32, i32
  }
  func.func @transform_4(%arg0: i32, %arg1: i32, %arg2: i32) -> (i32, i32, i32) {
    %c0_i32 = arith.constant 0 : i32
    %c0_i32_0 = arith.constant 0 : i32
    %c0_i32_1 = arith.constant 0 : i32
    return %arg2, %c0_i32, %c0_i32_0 : i32, i32, i32
  }
  func.func @transform_5(%arg0: i32, %arg1: i32, %arg2: i32) -> (i32, i32, i32) {
    %c0_i32 = arith.constant 0 : i32
    %c0_i32_0 = arith.constant 0 : i32
    %c0_i32_1 = arith.constant 0 : i32
    return %arg2, %c0_i32, %c0_i32_0 : i32, i32, i32
  }
  func.func @transform_6(%arg0: i32, %arg1: i32, %arg2: i32) -> (i32, i32, i32) {
    %c0_i32 = arith.constant 0 : i32
    %c0_i32_0 = arith.constant 0 : i32
    %c0_i32_1 = arith.constant 0 : i32
    return %arg2, %c0_i32, %c0_i32_0 : i32, i32, i32
  }
  func.func @transform_7(%arg0: i32, %arg1: i32, %arg2: i32) -> (i32, i32, i32) {
    %c0_i32 = arith.constant 0 : i32
    %c0_i32_0 = arith.constant 0 : i32
    %c0_i32_1 = arith.constant 0 : i32
    return %arg2, %c0_i32, %c0_i32_0 : i32, i32, i32
  }
  func.func @transform_8(%arg0: i32, %arg1: i32, %arg2: i32) -> (i32, i32, i32) {
    %c0_i32 = arith.constant 0 : i32
    %c0_i32_0 = arith.constant 0 : i32
    %c0_i32_1 = arith.constant 0 : i32
    return %arg2, %c0_i32, %c0_i32_0 : i32, i32, i32
  }
  func.func @transform_9(%arg0: i32, %arg1: i32, %arg2: i32) -> (i32, i32) {
    %c0_i32 = arith.constant 0 : i32
    %c0_i32_0 = arith.constant 0 : i32
    %c0_i32_1 = arith.constant 0 : i32
    return %c0_i32, %c0_i32_0 : i32, i32
  }
  func.func @transform_10(%arg0: i32, %arg1: i32, %arg2: i32) -> (i32, i32) {
    %c0_i32 = arith.constant 0 : i32
    %c0_i32_0 = arith.constant 0 : i32
    %c0_i32_1 = arith.constant 0 : i32
    return %c0_i32, %c0_i32_0 : i32, i32
  }
  func.func @transform_11(%arg0: i32, %arg1: i32, %arg2: i32) -> (i32, i32) {
    %c0_i32 = arith.constant 0 : i32
    %c0_i32_0 = arith.constant 0 : i32
    %c0_i32_1 = arith.constant 0 : i32
    return %c0_i32, %c0_i32_0 : i32, i32
  }
  func.func @transform_12(%arg0: i32, %arg1: i32, %arg2: i32) -> (i32, i32) {
    %c0_i32 = arith.constant 0 : i32
    %c0_i32_0 = arith.constant 0 : i32
    %c0_i32_1 = arith.constant 0 : i32
    return %c0_i32, %c0_i32_0 : i32, i32
  }
  func.func @transform_13(%arg0: i32, %arg1: i32, %arg2: i32) -> (i32, i32) {
    %c0_i32 = arith.constant 0 : i32
    %c0_i32_0 = arith.constant 0 : i32
    %c0_i32_1 = arith.constant 0 : i32
    return %c0_i32, %c0_i32_0 : i32, i32
  }
  func.func @transform_14(%arg0: i32, %arg1: i32, %arg2: i32) -> (i32, i32) {
    %c0_i32 = arith.constant 0 : i32
    %c0_i32_0 = arith.constant 0 : i32
    %c0_i32_1 = arith.constant 0 : i32
    return %c0_i32, %c0_i32_0 : i32, i32
  }
  func.func @transform_15(%arg0: i32, %arg1: i32, %arg2: i32) -> (i32, i32) {
    %c0_i32 = arith.constant 0 : i32
    %c0_i32_0 = arith.constant 0 : i32
    %c0_i32_1 = arith.constant 0 : i32
    return %c0_i32, %c0_i32_0 : i32, i32
  }
  func.func @transform_16(%arg0: i32, %arg1: i32, %arg2: i32) -> (i32, i32) {
    %c0_i32 = arith.constant 0 : i32
    %c0_i32_0 = arith.constant 0 : i32
    %c0_i32_1 = arith.constant 0 : i32
    return %c0_i32, %c0_i32_0 : i32, i32
  }
  func.func @transform_17(%arg0: i32, %arg1: i32, %arg2: i32) -> (i32, i32) {
    %c0_i32 = arith.constant 0 : i32
    %c0_i32_0 = arith.constant 0 : i32
    %c0_i32_1 = arith.constant 0 : i32
    return %c0_i32, %c0_i32_0 : i32, i32
  }
  func.func @transform_18(%arg0: i32, %arg1: i32, %arg2: i32) -> (i32, i32, i32) {
    %c0_i32 = arith.constant 0 : i32
    %c0_i32_0 = arith.constant 0 : i32
    return %arg0, %arg1, %c0_i32 : i32, i32, i32
  }
  func.func @transform_19(%arg0: i32, %arg1: i32, %arg2: i32) -> (i32, i32, i32, i32) {
    %c0_i32 = arith.constant 0 : i32
    %c0_i32_0 = arith.constant 0 : i32
    return %arg0, %arg2, %arg1, %c0_i32 : i32, i32, i32, i32
  }
}

module attributes {stable_mosaic.version = 11 : i64} {
  func.func @transformer_block_kernel(%arg0: i32, %arg1: i32, %arg2: i32, %arg3: memref<1x8x32xf32, #tpu.memory_space<vmem>>, %arg4: memref<1x8x32xf32, #tpu.memory_space<vmem>>, %arg5: memref<1x32x8xf32, #tpu.memory_space<vmem>>, %arg6: memref<1x1x8xf32, #tpu.memory_space<vmem>>, %arg7: memref<1x32x8xf32, #tpu.memory_space<vmem>>, %arg8: memref<1x1x8xf32, #tpu.memory_space<vmem>>, %arg9: memref<1x32x8xf32, #tpu.memory_space<vmem>>, %arg10: memref<1x1x8xf32, #tpu.memory_space<vmem>>, %arg11: memref<1x8x32xf32, #tpu.memory_space<vmem>>, %arg12: memref<1x32xf32, #tpu.memory_space<vmem>>, %arg13: memref<1x32xf32, #tpu.memory_space<vmem>>, %arg14: memref<1x32xf32, #tpu.memory_space<vmem>>, %arg15: memref<32x64xf32, #tpu.memory_space<vmem>>, %arg16: memref<1x64xf32, #tpu.memory_space<vmem>>, %arg17: memref<64x32xf32, #tpu.memory_space<vmem>>, %arg18: memref<1x32xf32, #tpu.memory_space<vmem>>, %arg19: memref<1x32xf32, #tpu.memory_space<vmem>>, %arg20: memref<1x32xf32, #tpu.memory_space<vmem>>, %arg21: memref<1x8x32xf32, #tpu.memory_space<vmem>>, %arg22: memref<1x1x8x8xf32, #tpu.memory_space<vmem>>, %arg23: memref<8x32xf32, #tpu.memory_space<vmem>>, %arg24: memref<4x8x8xf32, #tpu.memory_space<vmem>>, %arg25: memref<4x8x8xf32, #tpu.memory_space<vmem>>) attributes {dimension_semantics = [#tpu.dimension_semantics<parallel>, #tpu.dimension_semantics<arbitrary>, #tpu.dimension_semantics<arbitrary>], iteration_bounds = array<i64: 2, 1, 4>, scalar_prefetch = 0 : i64, scratch_operands = 3 : i64, tpu.core_type = #tpu.core_type<tc>, window_params = [{transform_indices = @transform_0, window_bounds = array<i64: 1, 8, 32>}, {transform_indices = @transform_1, window_bounds = array<i64: 1, 8, 32>}, {transform_indices = @transform_2, window_bounds = array<i64: 1, 32, 8>}, {transform_indices = @transform_3, window_bounds = array<i64: 1, 1, 8>}, {transform_indices = @transform_4, window_bounds = array<i64: 1, 32, 8>}, {transform_indices = @transform_5, window_bounds = array<i64: 1, 1, 8>}, {transform_indices = @transform_6, window_bounds = array<i64: 1, 32, 8>}, {transform_indices = @transform_7, window_bounds = array<i64: 1, 1, 8>}, {transform_indices = @transform_8, window_bounds = array<i64: 1, 8, 32>}, {pipeline_mode = #tpu.pipeline_mode<synchronous>, transform_indices = @transform_9, window_bounds = array<i64: 1, 32>}, {pipeline_mode = #tpu.pipeline_mode<synchronous>, transform_indices = @transform_10, window_bounds = array<i64: 1, 32>}, {pipeline_mode = #tpu.pipeline_mode<synchronous>, transform_indices = @transform_11, window_bounds = array<i64: 1, 32>}, {pipeline_mode = #tpu.pipeline_mode<synchronous>, transform_indices = @transform_12, window_bounds = array<i64: 32, 64>}, {pipeline_mode = #tpu.pipeline_mode<synchronous>, transform_indices = @transform_13, window_bounds = array<i64: 1, 64>}, {pipeline_mode = #tpu.pipeline_mode<synchronous>, transform_indices = @transform_14, window_bounds = array<i64: 64, 32>}, {pipeline_mode = #tpu.pipeline_mode<synchronous>, transform_indices = @transform_15, window_bounds = array<i64: 1, 32>}, {pipeline_mode = #tpu.pipeline_mode<synchronous>, transform_indices = @transform_16, window_bounds = array<i64: 1, 32>}, {pipeline_mode = #tpu.pipeline_mode<synchronous>, transform_indices = @transform_17, window_bounds = array<i64: 1, 32>}, {transform_indices = @transform_18, window_bounds = array<i64: 1, 8, 32>}, {transform_indices = @transform_19, window_bounds = array<i64: 1, 1, 8, 8>}]} {
    %c0_i32 = arith.constant 0 : i32
    %0 = arith.cmpi eq, %arg2, %c0_i32 : i32
    %1 = arith.extui %0 : i1 to i32
    %c0_i32_0 = arith.constant 0 : i32
    %2 = arith.cmpi ne, %1, %c0_i32_0 : i32
    scf.if %2 {
      %cst_32 = arith.constant 0.000000e+00 : f32
      %45 = vector.broadcast %cst_32 : f32 to vector<8x32xf32>
      %c0_33 = arith.constant 0 : index
      %c0_34 = arith.constant 0 : index
      %46 = vector.load %arg23[%c0_33, %c0_34] : memref<8x32xf32, #tpu.memory_space<vmem>>, vector<8x32xf32>
      tpu.vector_store %arg23[%c0_33, %c0_34], %45 {strides = array<i32>} : memref<8x32xf32, #tpu.memory_space<vmem>>, vector<8x32xf32>,
    } else {
    }
    %c0_i32_1 = arith.constant 0 : i32
    %3 = arith.cmpi eq, %arg1, %c0_i32_1 : i32
    %4 = arith.extui %3 : i1 to i32
    %c0_i32_2 = arith.constant 0 : i32
    %5 = arith.cmpi ne, %4, %c0_i32_2 : i32
    scf.if %5 {
      %c0_32 = arith.constant 0 : index
      %c0_33 = arith.constant 0 : index
      %c0_34 = arith.constant 0 : index
      %45 = vector.load %arg3[%c0_32, %c0_33, %c0_34] : memref<1x8x32xf32, #tpu.memory_space<vmem>>, vector<1x8x32xf32>
      %46 = vector.shape_cast %45 : vector<1x8x32xf32> to vector<8x32xf32>
      %c0_35 = arith.constant 0 : index
      %c0_36 = arith.constant 0 : index
      %c0_37 = arith.constant 0 : index
      %47 = vector.load %arg7[%c0_35, %c0_36, %c0_37] : memref<1x32x8xf32, #tpu.memory_space<vmem>>, vector<1x32x8xf32>
      %48 = vector.shape_cast %47 : vector<1x32x8xf32> to vector<32x8xf32>
      %cst_38 = arith.constant dense<0.000000e+00> : vector<8x8xf32>
      %49 = tpu.matmul %46, %48, %cst_38 {dimension_numbers = #tpu.dot_dimension_numbers<[1], [0], [0], [1], [0, 0, 1, 1], [], []>} : vector<8x32xf32>, vector<32x8xf32>, vector<8x8xf32> -> vector<8x8xf32>
      %c0_39 = arith.constant 0 : index
      %c0_40 = arith.constant 0 : index
      %c0_41 = arith.constant 0 : index
      %50 = vector.load %arg8[%c0_39, %c0_40, %c0_41] : memref<1x1x8xf32, #tpu.memory_space<vmem>>, vector<1x1x8xf32>
      %51 = vector.shape_cast %50 : vector<1x1x8xf32> to vector<1x8xf32>
      %52 = vector.broadcast %51 : vector<1x8xf32> to vector<8x8xf32>
      %53 = arith.addf %49, %52 : vector<8x8xf32>
      %c0_42 = arith.constant 0 : index
      %c0_43 = arith.constant 0 : index
      %c0_44 = arith.constant 0 : index
      %54 = vector.load %arg9[%c0_42, %c0_43, %c0_44] : memref<1x32x8xf32, #tpu.memory_space<vmem>>, vector<1x32x8xf32>
      %55 = vector.shape_cast %54 : vector<1x32x8xf32> to vector<32x8xf32>
      %cst_45 = arith.constant dense<0.000000e+00> : vector<8x8xf32>
      %56 = tpu.matmul %46, %55, %cst_45 {dimension_numbers = #tpu.dot_dimension_numbers<[1], [0], [0], [1], [0, 0, 1, 1], [], []>} : vector<8x32xf32>, vector<32x8xf32>, vector<8x8xf32> -> vector<8x8xf32>
      %c0_46 = arith.constant 0 : index
      %c0_47 = arith.constant 0 : index
      %c0_48 = arith.constant 0 : index
      %57 = vector.load %arg10[%c0_46, %c0_47, %c0_48] : memref<1x1x8xf32, #tpu.memory_space<vmem>>, vector<1x1x8xf32>
      %58 = vector.shape_cast %57 : vector<1x1x8xf32> to vector<1x8xf32>
      %59 = vector.broadcast %58 : vector<1x8xf32> to vector<8x8xf32>
      %60 = arith.addf %56, %59 : vector<8x8xf32>
      %61 = arith.index_cast %arg2 : i32 to index
      %c0_49 = arith.constant 0 : index
      %c0_50 = arith.constant 0 : index
      %62 = vector.load %arg24[%61, %c0_49, %c0_50] : memref<4x8x8xf32, #tpu.memory_space<vmem>>, vector<1x8x8xf32>
      %63 = vector.shape_cast %62 : vector<1x8x8xf32> to vector<8x8xf32>
      %64 = vector.shape_cast %53 : vector<8x8xf32> to vector<1x8x8xf32>
      tpu.vector_store %arg24[%61, %c0_49, %c0_50], %64 {strides = array<i32>} : memref<4x8x8xf32, #tpu.memory_space<vmem>>, vector<1x8x8xf32>,
      %65 = arith.index_cast %arg2 : i32 to index
      %c0_51 = arith.constant 0 : index
      %c0_52 = arith.constant 0 : index
      %66 = vector.load %arg25[%65, %c0_51, %c0_52] : memref<4x8x8xf32, #tpu.memory_space<vmem>>, vector<1x8x8xf32>
      %67 = vector.shape_cast %66 : vector<1x8x8xf32> to vector<8x8xf32>
      %68 = vector.shape_cast %60 : vector<8x8xf32> to vector<1x8x8xf32>
      tpu.vector_store %arg25[%65, %c0_51, %c0_52], %68 {strides = array<i32>} : memref<4x8x8xf32, #tpu.memory_space<vmem>>, vector<1x8x8xf32>,
    } else {
    }
    %6 = arith.index_cast %arg2 : i32 to index
    %c0 = arith.constant 0 : index
    %c0_3 = arith.constant 0 : index
    %7 = vector.load %arg24[%6, %c0, %c0_3] : memref<4x8x8xf32, #tpu.memory_space<vmem>>, vector<1x8x8xf32>
    %8 = vector.shape_cast %7 : vector<1x8x8xf32> to vector<8x8xf32>
    %9 = arith.index_cast %arg2 : i32 to index
    %c0_4 = arith.constant 0 : index
    %c0_5 = arith.constant 0 : index
    %10 = vector.load %arg25[%9, %c0_4, %c0_5] : memref<4x8x8xf32, #tpu.memory_space<vmem>>, vector<1x8x8xf32>
    %11 = vector.shape_cast %10 : vector<1x8x8xf32> to vector<8x8xf32>
    %c0_6 = arith.constant 0 : index
    %c0_7 = arith.constant 0 : index
    %c0_8 = arith.constant 0 : index
    %12 = vector.load %arg3[%c0_6, %c0_7, %c0_8] : memref<1x8x32xf32, #tpu.memory_space<vmem>>, vector<1x8x32xf32>
    %13 = vector.shape_cast %12 : vector<1x8x32xf32> to vector<8x32xf32>
    %c0_9 = arith.constant 0 : index
    %c0_10 = arith.constant 0 : index
    %c0_11 = arith.constant 0 : index
    %14 = vector.load %arg5[%c0_9, %c0_10, %c0_11] : memref<1x32x8xf32, #tpu.memory_space<vmem>>, vector<1x32x8xf32>
    %15 = vector.shape_cast %14 : vector<1x32x8xf32> to vector<32x8xf32>
    %cst = arith.constant dense<0.000000e+00> : vector<8x8xf32>
    %16 = tpu.matmul %13, %15, %cst {dimension_numbers = #tpu.dot_dimension_numbers<[1], [0], [0], [1], [0, 0, 1, 1], [], []>} : vector<8x32xf32>, vector<32x8xf32>, vector<8x8xf32> -> vector<8x8xf32>
    %c0_12 = arith.constant 0 : index
    %c0_13 = arith.constant 0 : index
    %c0_14 = arith.constant 0 : index
    %17 = vector.load %arg6[%c0_12, %c0_13, %c0_14] : memref<1x1x8xf32, #tpu.memory_space<vmem>>, vector<1x1x8xf32>
    %18 = vector.shape_cast %17 : vector<1x1x8xf32> to vector<1x8xf32>
    %19 = vector.broadcast %18 : vector<1x8xf32> to vector<8x8xf32>
    %20 = arith.addf %16, %19 : vector<8x8xf32>
    %cst_15 = arith.constant dense<0.000000e+00> : vector<8x8xf32>
    %21 = tpu.matmul %20, %8, %cst_15 {dimension_numbers = #tpu.dot_dimension_numbers<[1], [1], [0], [0], [0, 0, 1, 0], [], []>} : vector<8x8xf32>, vector<8x8xf32>, vector<8x8xf32> -> vector<8x8xf32>
    %cst_16 = arith.constant dense<0xFF800000> : vector<8xf32>
    %22 = vector.multi_reduction <maximumf>, %21, %cst_16 [1] : vector<8x8xf32> to vector<8xf32>
    %23 = vector.shape_cast %22 : vector<8xf32> to vector<8x1xf32>
    %24 = vector.broadcast %23 : vector<8x1xf32> to vector<8x8xf32>
    %25 = arith.subf %21, %24 : vector<8x8xf32>
    %26 = math.exp %25 : vector<8x8xf32>
    %cst_17 = arith.constant dense<0.000000e+00> : vector<8xf32>
    %27 = vector.multi_reduction <add>, %26, %cst_17 [1] : vector<8x8xf32> to vector<8xf32>
    %28 = vector.shape_cast %27 : vector<8xf32> to vector<8x1xf32>
    %29 = tpu.reciprocal %28 : vector<8x1xf32> -> vector<8x1xf32>
    %30 = vector.broadcast %29 : vector<8x1xf32> to vector<8x8xf32>
    %31 = arith.mulf %26, %30 : vector<8x8xf32>
    %c0_18 = arith.constant 0 : index
    %c0_19 = arith.constant 0 : index
    %c0_20 = arith.constant 0 : index
    %c0_21 = arith.constant 0 : index
    %32 = vector.load %arg22[%c0_18, %c0_19, %c0_20, %c0_21] : memref<1x1x8x8xf32, #tpu.memory_space<vmem>>, vector<1x1x8x8xf32>
    %33 = vector.shape_cast %32 : vector<1x1x8x8xf32> to vector<8x8xf32>
    %34 = vector.shape_cast %31 : vector<8x8xf32> to vector<1x1x8x8xf32>
    tpu.vector_store %arg22[%c0_18, %c0_19, %c0_20, %c0_21], %34 {strides = array<i32>} : memref<1x1x8x8xf32, #tpu.memory_space<vmem>>, vector<1x1x8x8xf32>,
    %cst_22 = arith.constant dense<0.000000e+00> : vector<8x8xf32>
    %35 = tpu.matmul %31, %11, %cst_22 {dimension_numbers = #tpu.dot_dimension_numbers<[1], [0], [0], [1], [0, 0, 1, 1], [], []>} : vector<8x8xf32>, vector<8x8xf32>, vector<8x8xf32> -> vector<8x8xf32>
    %c0_23 = arith.constant 0 : index
    %c0_24 = arith.constant 0 : index
    %36 = vector.load %arg23[%c0_23, %c0_24] : memref<8x32xf32, #tpu.memory_space<vmem>>, vector<8x32xf32>
    %c0_25 = arith.constant 0 : index
    %c0_26 = arith.constant 0 : index
    %c0_27 = arith.constant 0 : index
    %37 = vector.load %arg11[%c0_25, %c0_26, %c0_27] : memref<1x8x32xf32, #tpu.memory_space<vmem>>, vector<1x8x32xf32>
    %38 = vector.shape_cast %37 : vector<1x8x32xf32> to vector<8x32xf32>
    %cst_28 = arith.constant dense<0.000000e+00> : vector<8x32xf32>
    %39 = tpu.matmul %35, %38, %cst_28 {dimension_numbers = #tpu.dot_dimension_numbers<[1], [0], [0], [1], [0, 0, 1, 1], [], []>} : vector<8x8xf32>, vector<8x32xf32>, vector<8x32xf32> -> vector<8x32xf32>
    %40 = arith.addf %36, %39 : vector<8x32xf32>
    %c0_29 = arith.constant 0 : index
    %c0_30 = arith.constant 0 : index
    %41 = vector.load %arg23[%c0_29, %c0_30] : memref<8x32xf32, #tpu.memory_space<vmem>>, vector<8x32xf32>
    tpu.vector_store %arg23[%c0_29, %c0_30], %40 {strides = array<i32>} : memref<8x32xf32, #tpu.memory_space<vmem>>, vector<8x32xf32>,
    %c3_i32 = arith.constant 3 : i32
    %42 = arith.cmpi eq, %arg2, %c3_i32 : i32
    %43 = arith.extui %42 : i1 to i32
    %c0_i32_31 = arith.constant 0 : i32
    %44 = arith.cmpi ne, %43, %c0_i32_31 : i32
    scf.if %44 {
      %c0_32 = arith.constant 0 : index
      %c0_33 = arith.constant 0 : index
      %45 = vector.load %arg23[%c0_32, %c0_33] : memref<8x32xf32, #tpu.memory_space<vmem>>, vector<8x32xf32>
      %c0_34 = arith.constant 0 : index
      %c0_35 = arith.constant 0 : index
      %46 = vector.load %arg12[%c0_34, %c0_35] : memref<1x32xf32, #tpu.memory_space<vmem>>, vector<1x32xf32>
      %47 = vector.broadcast %46 : vector<1x32xf32> to vector<8x32xf32>
      %48 = arith.addf %45, %47 : vector<8x32xf32>
      %c0_36 = arith.constant 0 : index
      %c0_37 = arith.constant 0 : index
      %c0_38 = arith.constant 0 : index
      %49 = vector.load %arg4[%c0_36, %c0_37, %c0_38] : memref<1x8x32xf32, #tpu.memory_space<vmem>>, vector<1x8x32xf32>
      %50 = vector.shape_cast %49 : vector<1x8x32xf32> to vector<8x32xf32>
      %51 = arith.addf %50, %48 : vector<8x32xf32>
      %c0_39 = arith.constant 0 : index
      %c0_40 = arith.constant 0 : index
      %52 = vector.load %arg13[%c0_39, %c0_40] : memref<1x32xf32, #tpu.memory_space<vmem>>, vector<1x32xf32>
      %c0_41 = arith.constant 0 : index
      %c0_42 = arith.constant 0 : index
      %53 = vector.load %arg14[%c0_41, %c0_42] : memref<1x32xf32, #tpu.memory_space<vmem>>, vector<1x32xf32>
      %cst_43 = arith.constant dense<0.000000e+00> : vector<8xf32>
      %54 = vector.multi_reduction <add>, %51, %cst_43 [1] : vector<8x32xf32> to vector<8xf32>
      %55 = vector.shape_cast %54 : vector<8xf32> to vector<8x1xf32>
      %cst_44 = arith.constant 3.200000e+01 : f32
      %56 = vector.broadcast %cst_44 : f32 to vector<8x1xf32>
      %57 = arith.divf %55, %56 : vector<8x1xf32>
      %58 = vector.broadcast %57 : vector<8x1xf32> to vector<8x32xf32>
      %59 = arith.subf %51, %58 : vector<8x32xf32>
      %60 = arith.mulf %59, %59 : vector<8x32xf32>
      %cst_45 = arith.constant dense<0.000000e+00> : vector<8xf32>
      %61 = vector.multi_reduction <add>, %60, %cst_45 [1] : vector<8x32xf32> to vector<8xf32>
      %62 = vector.shape_cast %61 : vector<8xf32> to vector<8x1xf32>
      %cst_46 = arith.constant 3.200000e+01 : f32
      %63 = vector.broadcast %cst_46 : f32 to vector<8x1xf32>
      %64 = arith.divf %62, %63 : vector<8x1xf32>
      %65 = vector.broadcast %57 : vector<8x1xf32> to vector<8x32xf32>
      %66 = arith.subf %51, %65 : vector<8x32xf32>
      %cst_47 = arith.constant 9.99999974E-6 : f32
      %67 = vector.broadcast %cst_47 : f32 to vector<8x1xf32>
      %68 = arith.addf %64, %67 : vector<8x1xf32>
      %69 = math.rsqrt %68 : vector<8x1xf32>
      %70 = vector.broadcast %69 : vector<8x1xf32> to vector<8x32xf32>
      %71 = arith.mulf %66, %70 : vector<8x32xf32>
      %72 = vector.broadcast %52 : vector<1x32xf32> to vector<8x32xf32>
      %73 = arith.mulf %71, %72 : vector<8x32xf32>
      %74 = vector.broadcast %53 : vector<1x32xf32> to vector<8x32xf32>
      %75 = arith.addf %73, %74 : vector<8x32xf32>
      %c0_48 = arith.constant 0 : index
      %c0_49 = arith.constant 0 : index
      %76 = vector.load %arg15[%c0_48, %c0_49] : memref<32x64xf32, #tpu.memory_space<vmem>>, vector<32x64xf32>
      %cst_50 = arith.constant dense<0.000000e+00> : vector<8x64xf32>
      %77 = tpu.matmul %75, %76, %cst_50 {dimension_numbers = #tpu.dot_dimension_numbers<[1], [0], [0], [1], [0, 0, 1, 1], [], []>} : vector<8x32xf32>, vector<32x64xf32>, vector<8x64xf32> -> vector<8x64xf32>
      %c0_51 = arith.constant 0 : index
      %c0_52 = arith.constant 0 : index
      %78 = vector.load %arg16[%c0_51, %c0_52] : memref<1x64xf32, #tpu.memory_space<vmem>>, vector<1x64xf32>
      %79 = vector.broadcast %78 : vector<1x64xf32> to vector<8x64xf32>
      %80 = arith.addf %77, %79 : vector<8x64xf32>
      %cst_53 = arith.constant 0.000000e+00 : f32
      %81 = vector.broadcast %cst_53 : f32 to vector<8x64xf32>
      %82 = arith.maximumf %80, %81 : vector<8x64xf32>
      %c0_54 = arith.constant 0 : index
      %c0_55 = arith.constant 0 : index
      %83 = vector.load %arg17[%c0_54, %c0_55] : memref<64x32xf32, #tpu.memory_space<vmem>>, vector<64x32xf32>
      %cst_56 = arith.constant dense<0.000000e+00> : vector<8x32xf32>
      %84 = tpu.matmul %82, %83, %cst_56 {dimension_numbers = #tpu.dot_dimension_numbers<[1], [0], [0], [1], [0, 0, 1, 1], [], []>} : vector<8x64xf32>, vector<64x32xf32>, vector<8x32xf32> -> vector<8x32xf32>
      %c0_57 = arith.constant 0 : index
      %c0_58 = arith.constant 0 : index
      %85 = vector.load %arg18[%c0_57, %c0_58] : memref<1x32xf32, #tpu.memory_space<vmem>>, vector<1x32xf32>
      %86 = vector.broadcast %85 : vector<1x32xf32> to vector<8x32xf32>
      %87 = arith.addf %84, %86 : vector<8x32xf32>
      %88 = arith.addf %75, %87 : vector<8x32xf32>
      %c0_59 = arith.constant 0 : index
      %c0_60 = arith.constant 0 : index
      %89 = vector.load %arg19[%c0_59, %c0_60] : memref<1x32xf32, #tpu.memory_space<vmem>>, vector<1x32xf32>
      %c0_61 = arith.constant 0 : index
      %c0_62 = arith.constant 0 : index
      %90 = vector.load %arg20[%c0_61, %c0_62] : memref<1x32xf32, #tpu.memory_space<vmem>>, vector<1x32xf32>
      %cst_63 = arith.constant dense<0.000000e+00> : vector<8xf32>
      %91 = vector.multi_reduction <add>, %88, %cst_63 [1] : vector<8x32xf32> to vector<8xf32>
      %92 = vector.shape_cast %91 : vector<8xf32> to vector<8x1xf32>
      %cst_64 = arith.constant 3.200000e+01 : f32
      %93 = vector.broadcast %cst_64 : f32 to vector<8x1xf32>
      %94 = arith.divf %92, %93 : vector<8x1xf32>
      %95 = vector.broadcast %94 : vector<8x1xf32> to vector<8x32xf32>
      %96 = arith.subf %88, %95 : vector<8x32xf32>
      %97 = arith.mulf %96, %96 : vector<8x32xf32>
      %cst_65 = arith.constant dense<0.000000e+00> : vector<8xf32>
      %98 = vector.multi_reduction <add>, %97, %cst_65 [1] : vector<8x32xf32> to vector<8xf32>
      %99 = vector.shape_cast %98 : vector<8xf32> to vector<8x1xf32>
      %cst_66 = arith.constant 3.200000e+01 : f32
      %100 = vector.broadcast %cst_66 : f32 to vector<8x1xf32>
      %101 = arith.divf %99, %100 : vector<8x1xf32>
      %102 = vector.broadcast %94 : vector<8x1xf32> to vector<8x32xf32>
      %103 = arith.subf %88, %102 : vector<8x32xf32>
      %cst_67 = arith.constant 9.99999974E-6 : f32
      %104 = vector.broadcast %cst_67 : f32 to vector<8x1xf32>
      %105 = arith.addf %101, %104 : vector<8x1xf32>
      %106 = math.rsqrt %105 : vector<8x1xf32>
      %107 = vector.broadcast %106 : vector<8x1xf32> to vector<8x32xf32>
      %108 = arith.mulf %103, %107 : vector<8x32xf32>
      %109 = vector.broadcast %89 : vector<1x32xf32> to vector<8x32xf32>
      %110 = arith.mulf %108, %109 : vector<8x32xf32>
      %111 = vector.broadcast %90 : vector<1x32xf32> to vector<8x32xf32>
      %112 = arith.addf %110, %111 : vector<8x32xf32>
      %c0_68 = arith.constant 0 : index
      %c0_69 = arith.constant 0 : index
      %c0_70 = arith.constant 0 : index
      %113 = vector.load %arg21[%c0_68, %c0_69, %c0_70] : memref<1x8x32xf32, #tpu.memory_space<vmem>>, vector<1x8x32xf32>
      %114 = vector.shape_cast %113 : vector<1x8x32xf32> to vector<8x32xf32>
      %115 = vector.shape_cast %112 : vector<8x32xf32> to vector<1x8x32xf32>
      tpu.vector_store %arg21[%c0_68, %c0_69, %c0_70], %115 {strides = array<i32>} : memref<1x8x32xf32, #tpu.memory_space<vmem>>, vector<1x8x32xf32>,
    } else {
    }
    return
  }
  func.func @transform_0(%arg0: i32, %arg1: i32, %arg2: i32) -> (i32, i32, i32) {
    %c0_i32 = arith.constant 0 : i32
    %c0_i32_0 = arith.constant 0 : i32
    %c0_i32_1 = arith.constant 0 : i32
    return %arg0, %c0_i32, %c0_i32_0 : i32, i32, i32
  }
  func.func @transform_1(%arg0: i32, %arg1: i32, %arg2: i32) -> (i32, i32, i32) {
    %c0_i32 = arith.constant 0 : i32
    %c0_i32_0 = arith.constant 0 : i32
    return %arg0, %arg1, %c0_i32 : i32, i32, i32
  }
  func.func @transform_2(%arg0: i32, %arg1: i32, %arg2: i32) -> (i32, i32, i32) {
    %c0_i32 = arith.constant 0 : i32
    %c0_i32_0 = arith.constant 0 : i32
    %c0_i32_1 = arith.constant 0 : i32
    return %arg2, %c0_i32, %c0_i32_0 : i32, i32, i32
  }
  func.func @transform_3(%arg0: i32, %arg1: i32, %arg2: i32) -> (i32, i32, i32) {
    %c0_i32 = arith.constant 0 : i32
    %c0_i32_0 = arith.constant 0 : i32
    %c0_i32_1 = arith.constant 0 : i32
    return %arg2, %c0_i32, %c0_i32_0 : i32, i32, i32
  }
  func.func @transform_4(%arg0: i32, %arg1: i32, %arg2: i32) -> (i32, i32, i32) {
    %c0_i32 = arith.constant 0 : i32
    %c0_i32_0 = arith.constant 0 : i32
    %c0_i32_1 = arith.constant 0 : i32
    return %arg2, %c0_i32, %c0_i32_0 : i32, i32, i32
  }
  func.func @transform_5(%arg0: i32, %arg1: i32, %arg2: i32) -> (i32, i32, i32) {
    %c0_i32 = arith.constant 0 : i32
    %c0_i32_0 = arith.constant 0 : i32
    %c0_i32_1 = arith.constant 0 : i32
    return %arg2, %c0_i32, %c0_i32_0 : i32, i32, i32
  }
  func.func @transform_6(%arg0: i32, %arg1: i32, %arg2: i32) -> (i32, i32, i32) {
    %c0_i32 = arith.constant 0 : i32
    %c0_i32_0 = arith.constant 0 : i32
    %c0_i32_1 = arith.constant 0 : i32
    return %arg2, %c0_i32, %c0_i32_0 : i32, i32, i32
  }
  func.func @transform_7(%arg0: i32, %arg1: i32, %arg2: i32) -> (i32, i32, i32) {
    %c0_i32 = arith.constant 0 : i32
    %c0_i32_0 = arith.constant 0 : i32
    %c0_i32_1 = arith.constant 0 : i32
    return %arg2, %c0_i32, %c0_i32_0 : i32, i32, i32
  }
  func.func @transform_8(%arg0: i32, %arg1: i32, %arg2: i32) -> (i32, i32, i32) {
    %c0_i32 = arith.constant 0 : i32
    %c0_i32_0 = arith.constant 0 : i32
    %c0_i32_1 = arith.constant 0 : i32
    return %arg2, %c0_i32, %c0_i32_0 : i32, i32, i32
  }
  func.func @transform_9(%arg0: i32, %arg1: i32, %arg2: i32) -> (i32, i32) {
    %c0_i32 = arith.constant 0 : i32
    %c0_i32_0 = arith.constant 0 : i32
    %c0_i32_1 = arith.constant 0 : i32
    return %c0_i32, %c0_i32_0 : i32, i32
  }
  func.func @transform_10(%arg0: i32, %arg1: i32, %arg2: i32) -> (i32, i32) {
    %c0_i32 = arith.constant 0 : i32
    %c0_i32_0 = arith.constant 0 : i32
    %c0_i32_1 = arith.constant 0 : i32
    return %c0_i32, %c0_i32_0 : i32, i32
  }
  func.func @transform_11(%arg0: i32, %arg1: i32, %arg2: i32) -> (i32, i32) {
    %c0_i32 = arith.constant 0 : i32
    %c0_i32_0 = arith.constant 0 : i32
    %c0_i32_1 = arith.constant 0 : i32
    return %c0_i32, %c0_i32_0 : i32, i32
  }
  func.func @transform_12(%arg0: i32, %arg1: i32, %arg2: i32) -> (i32, i32) {
    %c0_i32 = arith.constant 0 : i32
    %c0_i32_0 = arith.constant 0 : i32
    %c0_i32_1 = arith.constant 0 : i32
    return %c0_i32, %c0_i32_0 : i32, i32
  }
  func.func @transform_13(%arg0: i32, %arg1: i32, %arg2: i32) -> (i32, i32) {
    %c0_i32 = arith.constant 0 : i32
    %c0_i32_0 = arith.constant 0 : i32
    %c0_i32_1 = arith.constant 0 : i32
    return %c0_i32, %c0_i32_0 : i32, i32
  }
  func.func @transform_14(%arg0: i32, %arg1: i32, %arg2: i32) -> (i32, i32) {
    %c0_i32 = arith.constant 0 : i32
    %c0_i32_0 = arith.constant 0 : i32
    %c0_i32_1 = arith.constant 0 : i32
    return %c0_i32, %c0_i32_0 : i32, i32
  }
  func.func @transform_15(%arg0: i32, %arg1: i32, %arg2: i32) -> (i32, i32) {
    %c0_i32 = arith.constant 0 : i32
    %c0_i32_0 = arith.constant 0 : i32
    %c0_i32_1 = arith.constant 0 : i32
    return %c0_i32, %c0_i32_0 : i32, i32
  }
  func.func @transform_16(%arg0: i32, %arg1: i32, %arg2: i32) -> (i32, i32) {
    %c0_i32 = arith.constant 0 : i32
    %c0_i32_0 = arith.constant 0 : i32
    %c0_i32_1 = arith.constant 0 : i32
    return %c0_i32, %c0_i32_0 : i32, i32
  }
  func.func @transform_17(%arg0: i32, %arg1: i32, %arg2: i32) -> (i32, i32) {
    %c0_i32 = arith.constant 0 : i32
    %c0_i32_0 = arith.constant 0 : i32
    %c0_i32_1 = arith.constant 0 : i32
    return %c0_i32, %c0_i32_0 : i32, i32
  }
  func.func @transform_18(%arg0: i32, %arg1: i32, %arg2: i32) -> (i32, i32, i32) {
    %c0_i32 = arith.constant 0 : i32
    %c0_i32_0 = arith.constant 0 : i32
    return %arg0, %arg1, %c0_i32 : i32, i32, i32
  }
  func.func @transform_19(%arg0: i32, %arg1: i32, %arg2: i32) -> (i32, i32, i32, i32) {
    %c0_i32 = arith.constant 0 : i32
    %c0_i32_0 = arith.constant 0 : i32
    return %arg0, %arg2, %arg1, %c0_i32 : i32, i32, i32, i32
  }
}

</mosaic_0001>

<bundles_post_ra>
// kernel: tpu_custom_call.1
= control target key start
LH: loop header
LB: loop body
LE: loop exit
PB: predicated region body
PF: predicated region fallthrough
CT: control target
= control target key end

     0   :  { %s2181_s0 = inlined_call_operand.vmem [shape: f32[2,8,32], index: 0, kind: input, shape index: {}]   ;;  %s2182_s1 = inlined_call_operand.vmem [shape: f32[2,8,32], index: 1, kind: input, shape index: {}]   ;;  %s2183_s2 = inlined_call_operand.vmem [shape: f32[4,32,8], index: 2, kind: input, shape index: {}]   ;;  %s2184_s3 = inlined_call_operand.vmem [shape: f32[4,1,8], index: 3, kind: input, shape index: {}]   ;;  %s2185_s4 = inlined_call_operand.vmem [shape: f32[4,32,8], index: 4, kind: input, shape index: {}]   ;;  %s2186_s5 = inlined_call_operand.vmem [shape: f32[4,1,8], index: 5, kind: input, shape index: {}]   ;;  %s2187_s6 = inlined_call_operand.vmem [shape: f32[4,32,8], index: 6, kind: input, shape index: {}]   ;;  %s2188_s7 = inlined_call_operand.vmem [shape: f32[4,1,8], index: 7, kind: input, shape index: {}]   ;;  %s2189_s8 = inlined_call_operand.vmem [shape: f32[4,8,32], index: 8, kind: input, shape index: {}]   ;;  %s2190_s9 = inlined_call_operand.vmem [shape: f32[1,32], index: 9, kind: input, shape index: {}]   ;;  %s2191_s10 = inlined_call_operand.vmem [shape: f32[1,32], index: 10, kind: input, shape index: {}]   ;;  %s2192_s11 = inlined_call_operand.vmem [shape: f32[1,32], index: 11, kind: input, shape index: {}]   ;;  %s2193_s12 = inlined_call_operand.vmem [shape: f32[32,64], index: 12, kind: input, shape index: {}]   ;;  %s2194_s13 = inlined_call_operand.vmem [shape: f32[1,64], index: 13, kind: input, shape index: {}]   ;;  %s2195_s14 = inlined_call_operand.vmem [shape: f32[64,32], index: 14, kind: input, shape index: {}]   ;;  %s2196_s15 = inlined_call_operand.vmem [shape: f32[1,32], index: 15, kind: input, shape index: {}]   ;;  %s2197_s16 = inlined_call_operand.vmem [shape: f32[1,32], index: 16, kind: input, shape index: {}]   ;;  %s2198_s17 = inlined_call_operand.vmem [shape: f32[1,32], index: 17, kind: input, shape index: {}]   ;;  %s2199_s18 = inlined_call_operand.hbm [shape: f32[2,8,32], index: 18, kind: output, shape index: {0}]   ;;  %s2200_s19 = inlined_call_operand.hbm [shape: f32[2,4,8,8], index: 19, kind: output, shape index: {1}]  }
   0x1   :  { %2227 = sst [smem:[#allocation29_spill]] %s2181_s0 }
   0x2   :  { %2228 = sst [smem:[#allocation30_spill]] %s2182_s1 }
   0x3   :  { %2229 = sst [smem:[#allocation31_spill]] %s2183_s2 }
   0x4   :  { %2230 = sst [smem:[#allocation32_spill]] %s2184_s3 }
   0x5   :  { %2231 = sst [smem:[#allocation33_spill]] %s2191_s10 }
   0x6   :  { %2232 = sst [smem:[#allocation34_spill]] %s2192_s11 }
   0x7   :  { %2233 = sst [smem:[#allocation35_spill]] %s2193_s12 }
   0x8   :  { %2234 = sst [smem:[#allocation36_spill]] %s2194_s13 }
   0x9   :  { %2235 = sst [smem:[#allocation37_spill]] %s2195_s14 }
   0xa   :  { %2236 = sst [smem:[#allocation38_spill]] %s2196_s15 }
   0xb   :  { %2237 = sst [smem:[#allocation39_spill]] %s2197_s16 }
   0xc   :  { %2238 = sst [smem:[#allocation40_spill]] %s2198_s17 }
   0xd   :  { %2239 = sst [smem:[#allocation41_spill]] %s2199_s18 }
   0xe   :  { %2240 = sst [smem:[#allocation42_spill]] %s2200_s19 }
   0xf   :  { %25 = vsyncpa [#allocation6], 0 }
  0x10   :  { %27 = vsyncpa [#allocation6 + $0x1], 0 }
  0x11   :  { %28 = vsyncpa [#allocation8], 0 }
  0x12   :  { %30 = vsyncpa [#allocation8 + $0x1], 0  ;;  %s1813_s0 = smov 0   ;;  %s1815_s30 = smov 0  }
  0x13   :  { %s1817_s20 = smov 0   ;;  %s1819_s21 = smov 0  }
  0x14   :  { %s1821_s1 = smov 0   ;;  %s1823_s22 = smov 0  }
  0x15   :  { %s1825_s2 = smov 0   ;;  %s1827_s23 = smov 0  }
  0x16   :  { %s1829_s24 = smov 0   ;;  %s1831_s25 = smov 0  }
  0x17   :  { %s1833_s3 = smov 0  }
  0x18 LB: > { %2241 = sst [smem:[#allocation11_spill]] %s1669_s0  ;;  %s1398_s26 = sadd.s32 4294967295, %s1709_s3   ;;  %s1709_s3 = sphi %s1833_s3, %s36_s3   ;;  %s1705_s25 = sphi %s1831_s25, %s2302_s25   ;;  %s1701_s24 = sphi %s1829_s24, %s2301_s24   ;;  %s1697_s23 = sphi %s1827_s23, %s2300_s23   ;;  %s1693_s2 = sphi %s1825_s2, %s2299_s2   ;;  %s1689_s22 = sphi %s1823_s22, %s2298_s22   ;;  %s1685_s1 = sphi %s1821_s1, %s2297_s1   ;;  %s1681_s21 = sphi %s1819_s21, %s2296_s21   ;;  %s1677_s20 = sphi %s1817_s20, %s2295_s20   ;;  %s1673_s30 = sphi %s1815_s30, %s2294_s30   ;;  %s1669_s0 = sphi %s1813_s0, %s2293_s0  }
  0x19   : > { %2242 = sst [smem:[#allocation12_spill]] %s1673_s30  ;;  %s1399_s27 = sadd.s32 4294967294, %s1709_s3  }
  0x1a   : > { %2243 = sst [smem:[#allocation13_spill]] %s1677_s20  ;;  %s48_s28 = sadd.s32 1, %s1701_s24 }
  0x1b   : > { %2244 = sst [smem:[#allocation14_spill]] %s1681_s21  ;;  %s55_s29 = sadd.s32 1, %s1705_s25 }
  0x1c   : > { %2245 = sst [smem:[#allocation15_spill]] %s1685_s1  ;;  %p49_p0 = scmp.ge.s32.totalorder %s48_s28, 4 }
  0x1d   : > { %2246 = sst [smem:[#allocation16_spill]] %s1689_s22  ;;  %s489_s19 = sadd.s32 1, %s1689_s22 }
  0x1e   : > { %2247 = sst [smem:[#allocation17_spill]] %s1697_s23  ;;  %p499_p1 = scmp.ne.s32.totalorder %s1689_s22, %s1685_s1 }
  0x1f   : > { %2248 = sst [smem:[#allocation18_spill]] %s1701_s24  ;;  %p1875_p2 = scmp.eq.s32.totalorder %s1398_s26, 7 }
  0x20   : > { %2249 = sst [smem:[#allocation19_spill]] %s1705_s25  ;;  %s2304_s28 = smov (%p49_p0, %s48_s28), 0 }
  0x21   : > { %2250 = sst [smem:[#allocation20_spill]] %s1709_s3  ;;  %s2306_s29 = smov (!%p49_p0, %s55_s29), %s1705_s25 }
  0x22   : > { %2252 = sst [smem:[#allocation21_spill]] %s2304_s28  ;;  %p1884_p3 = por %p1875_p2, %p499_p1 }
  0x23   : > { %p505_p4 = scmp.ne.s32.totalorder %s1685_s1, %s1681_s21  ;;  %p57_p5 = scmp.ge.s32.totalorder %s2306_s29, 2 }
  0x24   : > { %s2253_s17 = scalar_select %p1884_p3, 1, 0 }
  0x25   : > { %p1890_p6 = scmp.eq.s32.totalorder %s1399_s27, 7  ;;  %s513_s16 = ssub.s32 %s1701_s24, %s2304_s28 }
  0x26   : > { %2254 = sst [smem:[#allocation22_spill]] %s2253_s17  ;;  %s519_s15 = sadd.s32 1, %s1677_s20 }
  0x27   : > { %s2308_s29 = smov (%p57_p5, %s2306_s29), 0  ;;  %p1901_p7 = por %p1890_p6, %p505_p4 }
  0x28   : > { %2256 = sst [smem:[#allocation23_spill]] %s2308_s29  ;;  %p529_p8 = scmp.ne.s32.totalorder %s1677_s20, %s1673_s30 }
  0x29   : > { %s2257_s13 = scalar_select %p1901_p7, 1, 0 }
  0x2a   : > { %s484_s21 = ssub.s32 %s1705_s25, %s2308_s29  ;;  %p535_p9 = scmp.ne.s32.totalorder %s1673_s30, %s1669_s0 }
  0x2b   : > { %2258 = sst [smem:[#allocation24_spill]] %s2257_s13  ;;  %p487_p10 = scmp.eq.s32.totalorder %s484_s21, 0 }
  0x2c   : > { %s514_s27 = sor.u32 %s513_s16, %s484_s21  ;;  %p1913_p12 = por %p529_p8, %p1875_p2 }
  0x2d   : > { %p517_p11 = scmp.eq.s32.totalorder %s514_s27, 0  ;;  %p1925_p13 = por %p535_p9, %p1890_p6 }
  0x2e   : > { %s2259_s17 = scalar_select %p1913_p12, 1, 0 }
  0x2f   : > { %s1918_s28 = scalar_select %p487_p10, %s1689_s22, %s489_s19  }
  0x30   : > { %2260 = sst [smem:[#allocation25_spill]] %s2259_s17  ;;  %p1402_p0 = scmp.ge.s32.totalorder %s1709_s3, 1 }
  0x31   : > { %2261 = sst [smem:[#allocation26_spill]] %s1918_s28  ;;  %p647_p1 = scmp.lt.s32.totalorder %s1709_s3, 9 }
  0x32   : > { %s1921_s24 = scalar_select %p517_p11, %s1677_s20, %s519_s15  }
  0x33   : > { %s2263_s11 = scalar_select %p1925_p13, 1, 0 }
  0x34   : > { %2262 = sst [smem:[#allocation27_spill]] %s1921_s24  ;;  %p648_p4 = pnand %p1402_p0, %p647_p1 }
  0x35   : > { %2264 = sst [smem:[#allocation28_spill]] %s2263_s11  ;;  %s2210_s16 = sand.u32 (!%p648_p4), 1, %s1685_s1  }
  0x36   : > { %651 = sbr.rel (%p648_p4) target bundleno = 1729 (0x6c1), region = 92  ;;  %s2211_s15 = sand.u32 (!%p648_p4), 1, %s1673_s30  }
  0x37   : > { %s1935_s18 = sshll.u32 (!%p648_p4), %s2210_s16, 3  ;;  %s1939_s19 = sshll.u32 (!%p648_p4), %s2211_s15, 3 }
  0x38   : > { %p742_p2 = scmp.lt.s32.totalorder (!%p648_p4), %s1697_s23, 1  ;;  %p753_p5 = scmp.lt.s32.totalorder (!%p648_p4), %s1693_s2, 3 }
  0x39   : > { %s2265_s16 = sld [smem:[#allocation29_spill]] (!%p648_p4)  ;;  %s734_s14 = scalar_lea.vmem (!%p648_p4), [#allocation5], %s1935_s18 }
  0x3a   : > { %s2266_s24 = sld [smem:[#allocation30_spill]] (!%p648_p4)  ;;  %p1414_p6 = scmp.ne.s32.totalorder (!%p648_p4), %s1693_s2, 0 }
  0x3b   : > { %s743_s21 = scalar_select %p742_p2, %s1697_s23, 1 }
  0x3c   : > { %s1945_s26 = scalar_select %p753_p5, %s1693_s2, 3 }
  0x3d   : > { %s1405_s27 = sshll.u32 %s743_s21, 3  ;;  %s2267_s3 = sld [smem:[#allocation32_spill]] }
  0x3e   : > { %s1434_s11 = sshll.u32 %s1945_s26, 5  ;;  %s2268_s23 = sld [smem:[#allocation31_spill]] }
  0x3f   : > { %s1950_s28 = scalar_lea.vmem %s2265_s16, %s1405_s27  ;;  %s765_s25 = scalar_lea.vmem %s2185_s4, %s1434_s11 }
  0x40   : > { %s1955_s20 = scalar_lea.vmem %s2266_s24, %s1405_s27  ;;  %s768_s12 = scalar_lea.vmem %s2186_s5, %s1945_s26 }
  0x41   : > { %s1975_s15 = scalar_lea.vmem %s2187_s6, %s1434_s11  ;;  %s776_s0 = scalar_lea.vmem %s2188_s7, %s1945_s26 }
  0x42   : > { %s741_s21 = scalar_lea.vmem [#allocation7], %s1939_s19  ;;  %784 = sbr.rel (%p1414_p6) target bundleno = 73 (0x49), region = 96 }
  0x43   : > { %s760_s17 = scalar_lea.vmem %s2267_s3, %s1945_s26  ;;  %s1413_s3 = sshll.u32 %s1945_s26, 3 }
  0x44   : > { %s757_s10 = scalar_lea.vmem %s2268_s23, %s1434_s11  ;;  %s1985_s23 = scalar_lea.vmem %s2189_s8, %s1413_s3 }
  0x47   : > { %vm785_vm0 = vcmask 261120   ;;  %v1711_v0 = vmov 0.0  }
  0x48   : > { %786 = vst.msk [vmem:[#allocation2] sm:$0xff] %vm785_vm0, %v1711_v0 }
  0x49 PF: > { %v795_v1 = vld [vmem:[%s765_s25 + $0x18] sm:$0xff]  ;;  %v794_v2 = vld [vmem:[%s765_s25 + $0x10] sm:$0xff]  ;;  %v793_v4 = vld [vmem:[%s765_s25 + $0x8] sm:$0xff]  ;;  %vm800_vm1 = vcmask 261120   ;;  %vm854_vm2 = vcmask 64512   ;;  %p1424_p8 = scmp.ne.s32.totalorder %s1693_s2, 3 }
  0x4a   : > { %816 = vmatpush.msra.mxu0 %v795_v1  ;;  %v867_v3 = vld [vmem:[%s757_s10 + $0x18] sm:$0xff]  ;;  %v866_v5 = vld [vmem:[%s757_s10 + $0x10] sm:$0xff]  ;;  %v865_v6 = vld [vmem:[%s757_s10 + $0x8] sm:$0xff]  ;;  %s2270_s13 = sld [smem:[#allocation35_spill]] (!%p1424_p8) }
  0x4b   : > { %888 = vmatpush.msra.mxu2 %v867_v3  ;;  %v792_v7 = vld [vmem:[%s765_s25] sm:$0xff]  ;;  %s1417_s25 = sshll.u32 %s1693_s2, 3  ;;  %v827_v17 = vld [vmem:[%s1975_s15 + $0x18] sm:$0xff]  ;;  %v826_v18 = vld [vmem:[%s1975_s15 + $0x10] sm:$0xff]  ;;  %s2273_s1 = sld [smem:[#allocation34_spill]] (!%p1424_p8) }
  0x4c   : > { %817 = vmatpush.msra.mxu0 %v794_v2  ;;  %v791_v8 = vld [vmem:[%s1950_s28] sm:$0xff]  ;;  %844 = vmatpush.msra.mxu1 %v827_v17  ;;  %v825_v21 = vld [vmem:[%s1975_s15 + $0x8] sm:$0xff]  ;;  %s856_s24 = scalar_lea.vmem [#allocation4], %s1417_s25 }
  0x4d   : > { %889 = vmatpush.msra.mxu2 %v866_v5  ;;  %v864_v9 = vld [vmem:[%s757_s10] sm:$0xff]  ;;  %s853_s10 = scalar_lea.vmem [#allocation3], %s1417_s25 }
  0x4e   : > { %818 = vmatpush.msra.mxu0 %v793_v4  ;;  %v1539_v10 = vld [vmem:[%s768_s12] ss:$0 sm:$0xff]  ;;  %845 = vmatpush.msra.mxu1 %v826_v18 }
  0x4f   : > { %890 = vmatpush.msra.mxu2 %v865_v6  ;;  %v1540_v13 = vld [vmem:[%s760_s17] ss:$0 sm:$0xff]  ;;  %s2274_s17 = sld [smem:[#allocation36_spill]] (!%p1424_p8) }
  0x50   : > { %819 = vmatpush.msra.mxu0 %v792_v7  ;;  %v824_v22 = vld [vmem:[%s1975_s15] sm:$0xff]  ;;  %846 = vmatpush.msra.mxu1 %v825_v21  ;;  %s2275_s15 = sld [smem:[#allocation38_spill]] (!%p1424_p8) }
  0x51   : > { %1415 = vmatmul.msk.f32.vlgmr.msra.gmra.mxu0 %vm800_vm1, %v791_v8  ;;  %891 = vmatpush.msra.mxu2 %v864_v9  ;;  %v1541_v28 = vld [vmem:[%s776_s0] ss:$0 sm:$0xff]  ;;  %s2272_s0 = sld [smem:[#allocation33_spill]] (!%p1424_p8) }
  0x52   : > { %1419 = vmatmul.msk.f32.vlgmr.msra.gmra.mxu2 %vm800_vm1, %v791_v8  ;;  %847 = vmatpush.msra.mxu1 %v824_v22  ;;  %v972_v32 = vld [vmem:[%s1985_s23] sm:$0xff] }
  0x53   : > { %1416 = vmatmul.msk.f32.vlgmr.msra.gmra.mxu1 %vm800_vm1, %v791_v8  ;;  %991 = vmatpush.msrb.mxu0 %v972_v32  ;;  %v971_v46 = vld [vmem:[#allocation2] sm:$0xff] }
  0xce   : > { %v821_v11 = vpop.f32.mrf.mxu0 }
  0xcf   : > { %v822_v12 = vadd.f32 %v1539_v10, %v821_v11 }
  0xd0   : > { %v849_v29 = vpop.f32.mrf.mxu1 }
  0xd1   : > { %855 = vst.msk [vmem:[%s853_s10] sm:$0xff] %vm854_vm2, %v822_v12  ;;  %v850_v30 = vadd.f32 %v1541_v28, %v849_v29 }
  0xd3   : > { %857 = vst.msk [vmem:[%s856_s24] sm:$0xff] %vm854_vm2, %v850_v30 }
  0xd5   : > { %v893_v14 = vpop.f32.mrf.mxu2 }
  0xd6   : > { %v894_v15 = vadd.f32 %v1540_v13, %v893_v14 }
  0xd8   : > { %v860_v16 = vld [vmem:[%s853_s10] sm:$0xff]  ;;  %s2271_s10 = sld [smem:[#allocation37_spill]] (!%p1424_p8) }
  0xd9   : > { %1420 = vmatpush.xpose.msk.msra.mxu3 %vm854_vm2, %v860_v16 }
  0xda   : > { %v862_v31 = vld [vmem:[%s856_s24] sm:$0xff] }
  0xdc   : > { %1421 = vmatmul.msk.f32.vlgmr.msra.gmra.mxu3 %vm854_vm2, %v894_v15 }
  0xdd   : > { %966 = vmatpush.msrb.mxu3 %v862_v31 }
 0x15f   : > { %v920_v19 = vpop.f32.mrf.mxu3 }
 0x160   : > { %v923_v20 = vsel %vm854_vm2, %v920_v19, -inf }
 0x161   : > { %924 = vmax.xlane.f32.xlu0 %v923_v20 }
 0x1d4   : > { %v925_v23 = vpop.xlane.xlu0 %924 }
 0x1d5   : > { %v926_v24 = vsub.f32 %v920_v19, %v925_v23 }
 0x1d7   : > { %v927_v25 = vmul.f32 1.442695, %v926_v24 }
 0x1d9   : > { %1542 = vpow2.f32 %v927_v25 }
 0x1df   : > { %v1543_v26 = vpop.eup %1542 }
 0x1e0   : > { %v929_v27 = vsel %vm854_vm2, %v1543_v26, 0.0 }
 0x1e1   : > { %930 = vadd.xlane.f32.xlu0 %v929_v27 }
 0x254   : > { %v931_v33 = vpop.xlane.xlu0 %930 }
 0x255   : > { %1544 = vrcp.f32 %v931_v33  ;;  %v943_v37 = vand.u32 2147483648, %v931_v33  ;;  %v941_v39 = vand.u32 2147483647, %v931_v33  ;;  %vm937_vm4 = vweird.f32 %v931_v33 }
 0x257   : > { %v944_v41 = vor.u32 1.1754944e-38, %v943_v37  ;;  %vm942_vm6 = vcmp.eq.f32.partialorder %v941_v39, 8.507059e+37 }
 0x25b   : > { %v1545_v34 = vpop.eup %1544 }
 0x25c   : > { %v933_v35 = vmul.f32 %v1545_v34, %v931_v33  ;;  %vm938_vm3 = vweird.f32 %v1545_v34 }
 0x25d   : > { %vm939_vm5 = vmor %vm937_vm4, %vm938_vm3 }
 0x25e   : > { %v934_v36 = vsub.f32 1.0, %v933_v35 }
 0x260   : > { %v935_v38 = vmul.f32 %v1545_v34, %v934_v36 }
 0x262   : > { %v936_v40 = vadd.f32 %v1545_v34, %v935_v38 }
 0x264   : > { %v940_v42 = vsel %vm939_vm5, %v1545_v34, %v936_v40 }
 0x265   : > { %v945_v43 = vsel %vm942_vm6, %v944_v41, %v940_v42 }
 0x266   : > { %v946_v44 = vmul.f32 %v1543_v26, %v945_v43 }
 0x268   : > { %947 = vst.msk [vmem:[%s741_s21] sm:$0xff] %vm854_vm2, %v946_v44  ;;  %1422 = vmatmul.msk.f32.vlgmr.msrb.gmra.mxu3 %vm854_vm2, %v946_v44 }
 0x2eb   : > { %v968_v45 = vpop.f32.mrf.mxu3 }
 0x2ec   : > { %1423 = vmatmul.msk.f32.vlgmr.msrb.gmra.mxu0 %vm854_vm2, %v968_v45 }
 0x368   : > { %1001 = sbr.rel (%p1424_p8) target bundleno = 1685 (0x695), region = 104 }
 0x369   : > { %v993_v47 = vpop.f32.mrf.mxu0 }
 0x36a   : > { %v996_v48 = vadd.f32 %v993_v47, %v971_v46 }
 0x36c   : > { %997 = vst.msk [vmem:[#allocation2] sm:$0xff] %vm800_vm1, %v996_v48 }
 0x36d   : > { %v1546_v50 = vld [vmem:[%s2190_s9] ss:$0 sm:$0xff]  ;;  %v1712_v55 = vmov 32.0   ;;  %v1052_v3 = vld [vmem:[%s2270_s13 + $0x18] sm:$0xff]  ;;  %v1051_v4 = vld [vmem:[%s2270_s13 + $0x10] sm:$0xff]  ;;  %vm1093_vm11 = vcmask 523264  }
 0x36e   : > { %v1008_v51 = vld [vmem:[%s1955_s20] sm:$0xff]  ;;  %1553 = vrcp.f32 %v1712_v55  ;;  %1072 = vmatpush.msra.mxu0 %v1052_v3  ;;  %v1050_v5 = vld [vmem:[%s2270_s13 + $0x8] sm:$0xff]  ;;  %v1088_v7 = vld [vmem:[%s2271_s10 + $0x38] sm:$0xff] }
 0x36f   : > { %v1049_v6 = vld [vmem:[%s2270_s13] sm:$0xff]  ;;  %v1087_v8 = vld [vmem:[%s2271_s10 + $0x30] sm:$0xff]  ;;  %1105 = vmatpush.msra.mxu1 %v1088_v7  ;;  %v1086_v9 = vld [vmem:[%s2271_s10 + $0x28] sm:$0xff] }
 0x370   : > { %1073 = vmatpush.msra.mxu0 %v1051_v4  ;;  %v1085_v12 = vld [vmem:[%s2271_s10 + $0x20] sm:$0xff]  ;;  %v1084_v14 = vld [vmem:[%s2271_s10 + $0x18] sm:$0xff]  ;;  %v1083_v27 = vld [vmem:[%s2271_s10 + $0x10] sm:$0xff] }
 0x371   : > { %1106 = vmatpush.msra.mxu1 %v1087_v8  ;;  %v1547_v21 = vld [vmem:[%s2272_s0] ss:$0 sm:$0xff]  ;;  %v1082_v28 = vld [vmem:[%s2271_s10 + $0x8] sm:$0xff]  ;;  %s2276_s0 = sld [smem:[#allocation39_spill]] }
 0x372   : > { %1074 = vmatpush.msra.mxu0 %v1050_v5  ;;  %v1548_v24 = vld [vmem:[%s2273_s1] ss:$0 sm:$0xff]  ;;  %s2277_s1 = sld [smem:[#allocation40_spill]] }
 0x373   : > { %v1002_v49 = vld [vmem:[#allocation2] sm:$0xff]  ;;  %1107 = vmatpush.msra.mxu1 %v1086_v9 }
 0x374   : > { %v1007_v52 = vadd.f32 %v1546_v50, %v1002_v49  ;;  %v1554_v56 = vpop.eup %1553  ;;  %1075 = vmatpush.msra.mxu0 %v1049_v6  ;;  %v1081_v29 = vld [vmem:[%s2271_s10] sm:$0xff] }
 0x375   : > { %v1016_v57 = vmul.f32 32.0, %v1554_v56  ;;  %vm1020_vm7 = vweird.f32 %v1554_v56  ;;  %1108 = vmatpush.msra.mxu1 %v1085_v12  ;;  %v1549_v30 = vld [vmem:[%s2274_s17] ss:$0 sm:$0xff] }
 0x376   : > { %v1009_v53 = vadd.f32 %v1008_v51, %v1007_v52  ;;  %v1550_v34 = vld [vmem:[%s2275_s15] ss:$0 sm:$0xff] }
 0x377   : > { %v1017_v58 = vsub.f32 1.0, %v1016_v57  ;;  %1109 = vmatpush.msra.mxu1 %v1084_v14 }
 0x378   : > { %v1012_v54 = vsel %vm800_vm1, %v1009_v53, 0.0  ;;  %v1552_v55 = vld [vmem:[%s2277_s1] ss:$0 sm:$0xff] }
 0x379   : > { %1013 = vadd.xlane.f32.xlu0 %v1012_v54  ;;  %v1018_v59 = vmul.f32 %v1554_v56, %v1017_v58  ;;  %1110 = vmatpush.msra.mxu1 %v1083_v27 }
 0x37b   : > { %v1019_v60 = vadd.f32 %v1554_v56, %v1018_v59  ;;  %1111 = vmatpush.msra.mxu1 %v1082_v28 }
 0x37d   : > { %v2037_v61 = vsel %vm1020_vm7, %v1554_v56, %v1019_v60  ;;  %1112 = vmatpush.msra.mxu1 %v1081_v29 }
 0x3ec   : > { %v1014_v62 = vpop.xlane.xlu0 %1013 }
 0x3ed   : > { %v1022_v63 = vmul.f32 %v2037_v61, %v1014_v62 }
 0x3ef   : > { %v1023_v0 = vsub.f32 %v1009_v53, %v1022_v63  ;;  %v1551_v53 = vld [vmem:[%s2276_s0] ss:$0 sm:$0xff] }
 0x3f1   : > { %v1024_v1 = vmul.f32 %v1023_v0, %v1023_v0 }
 0x3f3   : > { %v1025_v2 = vsel %vm800_vm1, %v1024_v1, 0.0 }
 0x3f4   : > { %1026 = vadd.xlane.f32.xlu0 %v1025_v2 }
 0x467   : > { %v1027_v10 = vpop.xlane.xlu0 %1026 }
 0x468   : > { %v1028_v11 = vmul.f32 %v1027_v10, %v2037_v61 }
 0x46a   : > { %v1029_v13 = vadd.f32 1e-05, %v1028_v11 }
 0x46c   : > { %1555 = vrsqrt.f32 %v1029_v13  ;;  %vm1036_vm9 = vweird.f32 %v1029_v13 }
 0x472   : > { %v1556_v15 = vpop.eup %1555 }
 0x473   : > { %v1031_v16 = vmul.f32 %v1556_v15, %v1029_v13  ;;  %vm1037_vm8 = vweird.f32 %v1556_v15 }
 0x474   : > { %vm1038_vm10 = vmor %vm1036_vm9, %vm1037_vm8 }
 0x475   : > { %v1032_v17 = vmul.f32 %v1556_v15, %v1031_v16 }
 0x477   : > { %v1033_v18 = vmul.f32 0.5, %v1032_v17 }
 0x479   : > { %v1034_v19 = vsub.f32 1.5, %v1033_v18 }
 0x47b   : > { %v1035_v20 = vmul.f32 %v1556_v15, %v1034_v19 }
 0x47d   : > { %v1039_v22 = vsel %vm1038_vm10, %v1556_v15, %v1035_v20 }
 0x47e   : > { %v1040_v23 = vmul.f32 %v1039_v22, %v1023_v0 }
 0x480   : > { %v1044_v25 = vmul.f32 %v1547_v21, %v1040_v23 }
 0x482   : > { %v1048_v26 = vadd.f32 %v1548_v24, %v1044_v25 }
 0x484   : > { %1425 = vmatmul.msk.f32.vlgmr.msra.gmra.mxu0 %vm800_vm1, %v1048_v26 }
 0x501   : > { %v1077_v31 = vpop.f32.mrf.mxu0 }
 0x502   : > { %v1078_v32 = vadd.f32 %v1549_v30, %v1077_v31 }
 0x504   : > { %v1080_v33 = vmax.f32 %v1078_v32, 0.0 }
 0x506   : > { %1426 = vmatmul.msk.f32.vlgmr.msra.gmra.mxu1 %vm1093_vm11, %v1080_v33 }
 0x583   : > { %v1114_v35 = vpop.f32.mrf.mxu1 }
 0x584   : > { %v1115_v36 = vadd.f32 %v1550_v34, %v1114_v35 }
 0x586   : > { %v1117_v37 = vadd.f32 %v1115_v36, %v1048_v26 }
 0x588   : > { %v1120_v38 = vsel %vm800_vm1, %v1117_v37, 0.0 }
 0x589   : > { %1121 = vadd.xlane.f32.xlu1 %v1120_v38 }
 0x5fc   : > { %v1122_v39 = vpop.xlane.xlu1 %1121 }
 0x5fd   : > { %v1123_v40 = vmul.f32 %v1122_v39, %v2037_v61 }
 0x5ff   : > { %v1124_v41 = vsub.f32 %v1117_v37, %v1123_v40 }
 0x601   : > { %v1125_v42 = vmul.f32 %v1124_v41, %v1124_v41 }
 0x603   : > { %v1126_v43 = vsel %vm800_vm1, %v1125_v42, 0.0 }
 0x604   : > { %1127 = vadd.xlane.f32.xlu1 %v1126_v43 }
 0x677   : > { %v1128_v44 = vpop.xlane.xlu1 %1127 }
 0x678   : > { %v1129_v45 = vmul.f32 %v1128_v44, %v2037_v61 }
 0x67a   : > { %v1130_v46 = vadd.f32 1e-05, %v1129_v45 }
 0x67c   : > { %1557 = vrsqrt.f32 %v1130_v46  ;;  %vm1137_vm13 = vweird.f32 %v1130_v46 }
 0x682   : > { %v1558_v47 = vpop.eup %1557 }
 0x683   : > { %v1132_v48 = vmul.f32 %v1558_v47, %v1130_v46  ;;  %vm1138_vm12 = vweird.f32 %v1558_v47 }
 0x684   : > { %vm1139_vm14 = vmor %vm1137_vm13, %vm1138_vm12 }
 0x685   : > { %v1133_v49 = vmul.f32 %v1558_v47, %v1132_v48 }
 0x687   : > { %v1134_v50 = vmul.f32 0.5, %v1133_v49 }
 0x689   : > { %v1135_v51 = vsub.f32 1.5, %v1134_v50 }
 0x68b   : > { %v1136_v52 = vmul.f32 %v1558_v47, %v1135_v51 }
 0x68d   : > { %v1140_v54 = vsel %vm1139_vm14, %v1558_v47, %v1136_v52 }
 0x68e   : > { %v1141_v56 = vmul.f32 %v1140_v54, %v1124_v41 }
 0x690   : > { %v1145_v57 = vmul.f32 %v1551_v53, %v1141_v56 }
 0x692   : > { %v1149_v58 = vadd.f32 %v1552_v55, %v1145_v57 }
 0x694   : > { %1150 = vst.msk [vmem:[%s734_s14] sm:$0xff] %vm800_vm1, %v1149_v58 }
 0x695 PF: > { %s2278_s23 = sld [smem:[#allocation17_spill]]  ;;  %s1170_s24 = sshll.u32 %s734_s14, 4  ;;  %s1171_s24 = int_to_ptr.vmem [resolvable:$true] %s1170_s24 }
 0x696   : > { %s2279_s11 = sld [smem:[#allocation15_spill]] }
 0x697   : > { %s2281_s22 = sld [smem:[#allocation41_spill]] }
 0x69b   : > { %s1429_s25 = sshll.u32 %s2278_s23, 3 }
 0x69c   : > { %s2283_s15 = sand.u32 1, %s2279_s11  }
 0x69d   : > { %s2282_s12 = smov %s2281_s22  ;;  %s1168_s17 = scalar_lea.hbm %s2281_s22, %s1429_s25 }
 0x69e   : > { %s1172_s26 = sshll.u32 %s1168_s17, 4  ;;  %s1152_s20 = scalar_lea.sflag [#allocation6], %s2283_s15  ;;  %s1173_s26 = int_to_ptr.hbm [resolvable:$true] %s1172_s26 }
 0x69f   : > { %s1573_s27 = sshra.s32 %s1173_s26, 4  ;;  %s1579_s1 = scalar_lea.hbm %s2282_s12, 16  ;;  %s1574_s27 = int_to_ptr.hbm [resolvable:$true] %s1573_s27 }
 0x6a0   : > { %s1575_s0 = scalar_lea.hbm %s1574_s27, 8  ;;  %p1580_p0 = scmp.lt.s32.totalorder %s1574_s27, %s2282_s12 }
 0x6a1   : > { %p1576_p9 = scmp.ne.s32.totalorder %s1574_s27, %s1575_s0  ;;  %p1581_p1 = scmp.lt.s32.totalorder %s1579_s1, %s1575_s0 }
 0x6a3   : > { %p1577_p10 = pnand %p1576_p9, %p1884_p3  ;;  %p1582_p4 = por %p1581_p1, %p1580_p0 }
 0x6a5   : > { %p1578_p11 = pneg %p1577_p10 }
 0x6a7   : > { %p1583_p2 = pnand %p1582_p4, %p1578_p11 }
 0x6a9   : > { %1586 = shalt.err (!%p1583_p2)
}
 0x6aa   : > { %s2284_s18 = sld [smem:[#allocation12_spill]]  ;;  %s1430_s11 = sshll.u32 %s2278_s23, 2 }
 0x6ab   : > { %1437 = dma.vmem_to_hbm [thread:$0]  (%p1884_p3), %s1171_s24, 128, %s1173_s26, %s1152_s20  }
 0x6ac   : > { %s1187_s16 = sshll.u32 %s741_s21, 4  ;;  %s1183_s22 = sadd.s32 %s1693_s2, %s1430_s11  ;;  %s1188_s16 = int_to_ptr.vmem [resolvable:$true] %s1187_s16 }
 0x6ad   : > { %s1431_s17 = sshll.u32 %s1183_s22, 3  ;;  %s2286_s27 = sld [smem:[#allocation42_spill]] }
 0x6b0   : > { %s2287_s1 = sand.u32 1, %s2284_s18  }
 0x6b1   : > { %s1157_s29 = scalar_lea.sflag [#allocation8], %s2287_s1 }
 0x6b3   : > { %s1185_s0 = scalar_lea.hbm %s2286_s27, %s1431_s17  ;;  %s1607_s2 = scalar_lea.hbm %s2286_s27, 64 }
 0x6b4   : > { %s1189_s30 = sshll.u32 %s1185_s0, 4  ;;  %s1190_s30 = int_to_ptr.hbm [resolvable:$true] %s1189_s30 }
 0x6b5   : > { %s1601_s28 = sshra.s32 %s1190_s30, 4  ;;  %s1602_s28 = int_to_ptr.hbm [resolvable:$true] %s1601_s28 }
 0x6b6   : > { %s1603_s25 = scalar_lea.hbm %s1602_s28, 8  ;;  %p1608_p8 = scmp.lt.s32.totalorder %s1602_s28, %s2286_s27 }
 0x6b7   : > { %p1604_p5 = scmp.ne.s32.totalorder %s1602_s28, %s1603_s25  ;;  %p1609_p9 = scmp.lt.s32.totalorder %s1607_s2, %s1603_s25 }
 0x6b9   : > { %p1605_p3 = pnand %p1604_p5, %p1913_p12  ;;  %p1610_p10 = por %p1609_p9, %p1608_p8 }
 0x6bb   : > { %p1606_p6 = pneg %p1605_p3 }
 0x6bd   : > { %p1611_p11 = pnand %p1610_p10, %p1606_p6 }
 0x6bf   : > { %1614 = shalt.err (!%p1611_p11)
}
 0x6c0   : > { %1438 = dma.vmem_to_hbm [thread:$0]  (%p1913_p12), %s1188_s16, 128, %s1190_s30, %s1157_s29  }
 0x6c1 PF: > { %s2288_s26 = sld [smem:[#allocation20_spill]] }
 0x6c2   : > { %s2289_s20 = sld [smem:[#allocation14_spill]] }
 0x6c7   : > { %p1448_p0 = scmp.ge.s32.totalorder %s2288_s26, 2 }
 0x6c8   : > { %s1201_s11 = sand.u32 1, %s2289_s20  }
 0x6c9   : > { %p1442_p1 = pnand %p1448_p0, %p1901_p7  ;;  %s1202_s22 = scalar_lea.sflag [#allocation6], %s1201_s11 }
 0x6cb   : > { %p1443_p4 = pneg %p1442_p1 }
 0x6cd   : > { %1660 = dma.done.wait (%p1443_p4), %s1202_s22, 128  }
 0x6ce   : > { %1662 = vsyncadd (%p1443_p4), %s1202_s22, 4294967168  ;;  %s2291_s17 = sld [smem:[#allocation11_spill]]  ;;  %p1445_p2 = pnand %p1448_p0, %p1925_p13 }
 0x6d0   : > { %p1446_p5 = pneg %p1445_p2 }
 0x6d4   : > { %s1211_s3 = sand.u32 1, %s2291_s17  }
 0x6d5   : > { %s1212_s14 = scalar_lea.sflag [#allocation8], %s1211_s3 }
 0x6d6   : > { %1664 = dma.done.wait (%p1446_p5), %s1212_s14, 128  }
 0x6d7   : > { %1666 = vsyncadd (%p1446_p5), %s1212_s14, 4294967168  ;;  %s36_s3 = sadd.s32 1, %s2288_s26   ;;  %s2293_s0 = sld [smem:[#allocation12_spill]] }
 0x6d8   : > { %p33_p12 = scmp.ge.s32.totalorder %s36_s3, 10   ;;  %s2294_s30 = sld [smem:[#allocation13_spill]] }
 0x6d9   : > { %s2295_s20 = sld [smem:[#allocation27_spill]] }
 0x6da   : > { %s2296_s21 = sld [smem:[#allocation15_spill]] }
 0x6db   : > { %s2297_s1 = sld [smem:[#allocation16_spill]] }
 0x6dc   : > { %s2298_s22 = sld [smem:[#allocation26_spill]]  ;;  %35 = sbr.rel (!%p33_p12) target bundleno = 24 (0x18), region = 184 }
 0x6dd   : > { %s2299_s2 = sld [smem:[#allocation18_spill]] }
 0x6de   : > { %s2300_s23 = sld [smem:[#allocation19_spill]] }
 0x6df   : > { %s2301_s24 = sld [smem:[#allocation21_spill]] }
 0x6e0   : > { %s2302_s25 = sld [smem:[#allocation23_spill]] }
 0x6e1   :  { %1218 = vsyncpa [#allocation6], 1 }
 0x6e2   :  { %1220 = vsyncpa [#allocation6 + $0x1], 1 }
 0x6e3   :  { %1221 = vsyncpa [#allocation8], 1 }
 0x6e4   :  { %1223 = vsyncpa [#allocation8 + $0x1], 1 }

// kernel: tpu_custom_call.1
= control target key start
LH: loop header
LB: loop body
LE: loop exit
PB: predicated region body
PF: predicated region fallthrough
CT: control target
= control target key end

     0   :  { %s2181_s0 = inlined_call_operand.vmem [shape: f32[2,8,32], index: 0, kind: input, shape index: {}]   ;;  %s2182_s1 = inlined_call_operand.vmem [shape: f32[2,8,32], index: 1, kind: input, shape index: {}]   ;;  %s2183_s2 = inlined_call_operand.vmem [shape: f32[4,32,8], index: 2, kind: input, shape index: {}]   ;;  %s2184_s3 = inlined_call_operand.vmem [shape: f32[4,1,8], index: 3, kind: input, shape index: {}]   ;;  %s2185_s4 = inlined_call_operand.vmem [shape: f32[4,32,8], index: 4, kind: input, shape index: {}]   ;;  %s2186_s5 = inlined_call_operand.vmem [shape: f32[4,1,8], index: 5, kind: input, shape index: {}]   ;;  %s2187_s6 = inlined_call_operand.vmem [shape: f32[4,32,8], index: 6, kind: input, shape index: {}]   ;;  %s2188_s7 = inlined_call_operand.vmem [shape: f32[4,1,8], index: 7, kind: input, shape index: {}]   ;;  %s2189_s8 = inlined_call_operand.vmem [shape: f32[4,8,32], index: 8, kind: input, shape index: {}]   ;;  %s2190_s9 = inlined_call_operand.vmem [shape: f32[1,32], index: 9, kind: input, shape index: {}]   ;;  %s2191_s10 = inlined_call_operand.vmem [shape: f32[1,32], index: 10, kind: input, shape index: {}]   ;;  %s2192_s11 = inlined_call_operand.vmem [shape: f32[1,32], index: 11, kind: input, shape index: {}]   ;;  %s2193_s12 = inlined_call_operand.vmem [shape: f32[32,64], index: 12, kind: input, shape index: {}]   ;;  %s2194_s13 = inlined_call_operand.vmem [shape: f32[1,64], index: 13, kind: input, shape index: {}]   ;;  %s2195_s14 = inlined_call_operand.vmem [shape: f32[64,32], index: 14, kind: input, shape index: {}]   ;;  %s2196_s15 = inlined_call_operand.vmem [shape: f32[1,32], index: 15, kind: input, shape index: {}]   ;;  %s2197_s16 = inlined_call_operand.vmem [shape: f32[1,32], index: 16, kind: input, shape index: {}]   ;;  %s2198_s17 = inlined_call_operand.vmem [shape: f32[1,32], index: 17, kind: input, shape index: {}]   ;;  %s2199_s18 = inlined_call_operand.hbm [shape: f32[2,8,32], index: 18, kind: output, shape index: {0}]   ;;  %s2200_s19 = inlined_call_operand.hbm [shape: f32[2,4,8,8], index: 19, kind: output, shape index: {1}]  }
   0x1   :  { %2227 = sst [smem:[#allocation29_spill]] %s2181_s0 }
   0x2   :  { %2228 = sst [smem:[#allocation30_spill]] %s2182_s1 }
   0x3   :  { %2229 = sst [smem:[#allocation31_spill]] %s2183_s2 }
   0x4   :  { %2230 = sst [smem:[#allocation32_spill]] %s2184_s3 }
   0x5   :  { %2231 = sst [smem:[#allocation33_spill]] %s2191_s10 }
   0x6   :  { %2232 = sst [smem:[#allocation34_spill]] %s2192_s11 }
   0x7   :  { %2233 = sst [smem:[#allocation35_spill]] %s2193_s12 }
   0x8   :  { %2234 = sst [smem:[#allocation36_spill]] %s2194_s13 }
   0x9   :  { %2235 = sst [smem:[#allocation37_spill]] %s2195_s14 }
   0xa   :  { %2236 = sst [smem:[#allocation38_spill]] %s2196_s15 }
   0xb   :  { %2237 = sst [smem:[#allocation39_spill]] %s2197_s16 }
   0xc   :  { %2238 = sst [smem:[#allocation40_spill]] %s2198_s17 }
   0xd   :  { %2239 = sst [smem:[#allocation41_spill]] %s2199_s18 }
   0xe   :  { %2240 = sst [smem:[#allocation42_spill]] %s2200_s19 }
   0xf   :  { %25 = vsyncpa [#allocation6], 0 }
  0x10   :  { %27 = vsyncpa [#allocation6 + $0x1], 0 }
  0x11   :  { %28 = vsyncpa [#allocation8], 0 }
  0x12   :  { %30 = vsyncpa [#allocation8 + $0x1], 0  ;;  %s1813_s0 = smov 0   ;;  %s1815_s30 = smov 0  }
  0x13   :  { %s1817_s20 = smov 0   ;;  %s1819_s21 = smov 0  }
  0x14   :  { %s1821_s1 = smov 0   ;;  %s1823_s22 = smov 0  }
  0x15   :  { %s1825_s2 = smov 0   ;;  %s1827_s23 = smov 0  }
  0x16   :  { %s1829_s24 = smov 0   ;;  %s1831_s25 = smov 0  }
  0x17   :  { %s1833_s3 = smov 0  }
  0x18 LB: > { %2241 = sst [smem:[#allocation11_spill]] %s1669_s0  ;;  %s1398_s26 = sadd.s32 4294967295, %s1709_s3   ;;  %s1709_s3 = sphi %s1833_s3, %s36_s3   ;;  %s1705_s25 = sphi %s1831_s25, %s2302_s25   ;;  %s1701_s24 = sphi %s1829_s24, %s2301_s24   ;;  %s1697_s23 = sphi %s1827_s23, %s2300_s23   ;;  %s1693_s2 = sphi %s1825_s2, %s2299_s2   ;;  %s1689_s22 = sphi %s1823_s22, %s2298_s22   ;;  %s1685_s1 = sphi %s1821_s1, %s2297_s1   ;;  %s1681_s21 = sphi %s1819_s21, %s2296_s21   ;;  %s1677_s20 = sphi %s1817_s20, %s2295_s20   ;;  %s1673_s30 = sphi %s1815_s30, %s2294_s30   ;;  %s1669_s0 = sphi %s1813_s0, %s2293_s0  }
  0x19   : > { %2242 = sst [smem:[#allocation12_spill]] %s1673_s30  ;;  %s1399_s27 = sadd.s32 4294967294, %s1709_s3  }
  0x1a   : > { %2243 = sst [smem:[#allocation13_spill]] %s1677_s20  ;;  %s48_s28 = sadd.s32 1, %s1701_s24 }
  0x1b   : > { %2244 = sst [smem:[#allocation14_spill]] %s1681_s21  ;;  %s55_s29 = sadd.s32 1, %s1705_s25 }
  0x1c   : > { %2245 = sst [smem:[#allocation15_spill]] %s1685_s1  ;;  %p49_p0 = scmp.ge.s32.totalorder %s48_s28, 4 }
  0x1d   : > { %2246 = sst [smem:[#allocation16_spill]] %s1689_s22  ;;  %s489_s19 = sadd.s32 1, %s1689_s22 }
  0x1e   : > { %2247 = sst [smem:[#allocation17_spill]] %s1697_s23  ;;  %p499_p1 = scmp.ne.s32.totalorder %s1689_s22, %s1685_s1 }
  0x1f   : > { %2248 = sst [smem:[#allocation18_spill]] %s1701_s24  ;;  %p1875_p2 = scmp.eq.s32.totalorder %s1398_s26, 7 }
  0x20   : > { %2249 = sst [smem:[#allocation19_spill]] %s1705_s25  ;;  %s2304_s28 = smov (%p49_p0, %s48_s28), 0 }
  0x21   : > { %2250 = sst [smem:[#allocation20_spill]] %s1709_s3  ;;  %s2306_s29 = smov (!%p49_p0, %s55_s29), %s1705_s25 }
  0x22   : > { %2252 = sst [smem:[#allocation21_spill]] %s2304_s28  ;;  %p1884_p3 = por %p1875_p2, %p499_p1 }
  0x23   : > { %p505_p4 = scmp.ne.s32.totalorder %s1685_s1, %s1681_s21  ;;  %p57_p5 = scmp.ge.s32.totalorder %s2306_s29, 2 }
  0x24   : > { %s2253_s17 = scalar_select %p1884_p3, 1, 0 }
  0x25   : > { %p1890_p6 = scmp.eq.s32.totalorder %s1399_s27, 7  ;;  %s513_s16 = ssub.s32 %s1701_s24, %s2304_s28 }
  0x26   : > { %2254 = sst [smem:[#allocation22_spill]] %s2253_s17  ;;  %s519_s15 = sadd.s32 1, %s1677_s20 }
  0x27   : > { %s2308_s29 = smov (%p57_p5, %s2306_s29), 0  ;;  %p1901_p7 = por %p1890_p6, %p505_p4 }
  0x28   : > { %2256 = sst [smem:[#allocation23_spill]] %s2308_s29  ;;  %p529_p8 = scmp.ne.s32.totalorder %s1677_s20, %s1673_s30 }
  0x29   : > { %s2257_s13 = scalar_select %p1901_p7, 1, 0 }
  0x2a   : > { %s484_s21 = ssub.s32 %s1705_s25, %s2308_s29  ;;  %p535_p9 = scmp.ne.s32.totalorder %s1673_s30, %s1669_s0 }
  0x2b   : > { %2258 = sst [smem:[#allocation24_spill]] %s2257_s13  ;;  %p487_p10 = scmp.eq.s32.totalorder %s484_s21, 0 }
  0x2c   : > { %s514_s27 = sor.u32 %s513_s16, %s484_s21  ;;  %p1913_p12 = por %p529_p8, %p1875_p2 }
  0x2d   : > { %p517_p11 = scmp.eq.s32.totalorder %s514_s27, 0  ;;  %p1925_p13 = por %p535_p9, %p1890_p6 }
  0x2e   : > { %s2259_s17 = scalar_select %p1913_p12, 1, 0 }
  0x2f   : > { %s1918_s28 = scalar_select %p487_p10, %s1689_s22, %s489_s19  }
  0x30   : > { %2260 = sst [smem:[#allocation25_spill]] %s2259_s17  ;;  %p1402_p0 = scmp.ge.s32.totalorder %s1709_s3, 1 }
  0x31   : > { %2261 = sst [smem:[#allocation26_spill]] %s1918_s28  ;;  %p647_p1 = scmp.lt.s32.totalorder %s1709_s3, 9 }
  0x32   : > { %s1921_s24 = scalar_select %p517_p11, %s1677_s20, %s519_s15  }
  0x33   : > { %s2263_s11 = scalar_select %p1925_p13, 1, 0 }
  0x34   : > { %2262 = sst [smem:[#allocation27_spill]] %s1921_s24  ;;  %p648_p4 = pnand %p1402_p0, %p647_p1 }
  0x35   : > { %2264 = sst [smem:[#allocation28_spill]] %s2263_s11  ;;  %s2210_s16 = sand.u32 (!%p648_p4), 1, %s1685_s1  }
  0x36   : > { %651 = sbr.rel (%p648_p4) target bundleno = 1729 (0x6c1), region = 92  ;;  %s2211_s15 = sand.u32 (!%p648_p4), 1, %s1673_s30  }
  0x37   : > { %s1935_s18 = sshll.u32 (!%p648_p4), %s2210_s16, 3  ;;  %s1939_s19 = sshll.u32 (!%p648_p4), %s2211_s15, 3 }
  0x38   : > { %p742_p2 = scmp.lt.s32.totalorder (!%p648_p4), %s1697_s23, 1  ;;  %p753_p5 = scmp.lt.s32.totalorder (!%p648_p4), %s1693_s2, 3 }
  0x39   : > { %s2265_s16 = sld [smem:[#allocation29_spill]] (!%p648_p4)  ;;  %s734_s14 = scalar_lea.vmem (!%p648_p4), [#allocation5], %s1935_s18 }
  0x3a   : > { %s2266_s24 = sld [smem:[#allocation30_spill]] (!%p648_p4)  ;;  %p1414_p6 = scmp.ne.s32.totalorder (!%p648_p4), %s1693_s2, 0 }
  0x3b   : > { %s743_s21 = scalar_select %p742_p2, %s1697_s23, 1 }
  0x3c   : > { %s1945_s26 = scalar_select %p753_p5, %s1693_s2, 3 }
  0x3d   : > { %s1405_s27 = sshll.u32 %s743_s21, 3  ;;  %s2267_s3 = sld [smem:[#allocation32_spill]] }
  0x3e   : > { %s1434_s11 = sshll.u32 %s1945_s26, 5  ;;  %s2268_s23 = sld [smem:[#allocation31_spill]] }
  0x3f   : > { %s1950_s28 = scalar_lea.vmem %s2265_s16, %s1405_s27  ;;  %s765_s25 = scalar_lea.vmem %s2185_s4, %s1434_s11 }
  0x40   : > { %s1955_s20 = scalar_lea.vmem %s2266_s24, %s1405_s27  ;;  %s768_s12 = scalar_lea.vmem %s2186_s5, %s1945_s26 }
  0x41   : > { %s1975_s15 = scalar_lea.vmem %s2187_s6, %s1434_s11  ;;  %s776_s0 = scalar_lea.vmem %s2188_s7, %s1945_s26 }
  0x42   : > { %s741_s21 = scalar_lea.vmem [#allocation7], %s1939_s19  ;;  %784 = sbr.rel (%p1414_p6) target bundleno = 73 (0x49), region = 96 }
  0x43   : > { %s760_s17 = scalar_lea.vmem %s2267_s3, %s1945_s26  ;;  %s1413_s3 = sshll.u32 %s1945_s26, 3 }
  0x44   : > { %s757_s10 = scalar_lea.vmem %s2268_s23, %s1434_s11  ;;  %s1985_s23 = scalar_lea.vmem %s2189_s8, %s1413_s3 }
  0x47   : > { %vm785_vm0 = vcmask 261120   ;;  %v1711_v0 = vmov 0.0  }
  0x48   : > { %786 = vst.msk [vmem:[#allocation2] sm:$0xff] %vm785_vm0, %v1711_v0 }
  0x49 PF: > { %v795_v1 = vld [vmem:[%s765_s25 + $0x18] sm:$0xff]  ;;  %v794_v2 = vld [vmem:[%s765_s25 + $0x10] sm:$0xff]  ;;  %v793_v4 = vld [vmem:[%s765_s25 + $0x8] sm:$0xff]  ;;  %vm800_vm1 = vcmask 261120   ;;  %vm854_vm2 = vcmask 64512   ;;  %p1424_p8 = scmp.ne.s32.totalorder %s1693_s2, 3 }
  0x4a   : > { %816 = vmatpush.msra.mxu0 %v795_v1  ;;  %v867_v3 = vld [vmem:[%s757_s10 + $0x18] sm:$0xff]  ;;  %v866_v5 = vld [vmem:[%s757_s10 + $0x10] sm:$0xff]  ;;  %v865_v6 = vld [vmem:[%s757_s10 + $0x8] sm:$0xff]  ;;  %s2270_s13 = sld [smem:[#allocation35_spill]] (!%p1424_p8) }
  0x4b   : > { %888 = vmatpush.msra.mxu2 %v867_v3  ;;  %v792_v7 = vld [vmem:[%s765_s25] sm:$0xff]  ;;  %s1417_s25 = sshll.u32 %s1693_s2, 3  ;;  %v827_v17 = vld [vmem:[%s1975_s15 + $0x18] sm:$0xff]  ;;  %v826_v18 = vld [vmem:[%s1975_s15 + $0x10] sm:$0xff]  ;;  %s2273_s1 = sld [smem:[#allocation34_spill]] (!%p1424_p8) }
  0x4c   : > { %817 = vmatpush.msra.mxu0 %v794_v2  ;;  %v791_v8 = vld [vmem:[%s1950_s28] sm:$0xff]  ;;  %844 = vmatpush.msra.mxu1 %v827_v17  ;;  %v825_v21 = vld [vmem:[%s1975_s15 + $0x8] sm:$0xff]  ;;  %s856_s24 = scalar_lea.vmem [#allocation4], %s1417_s25 }
  0x4d   : > { %889 = vmatpush.msra.mxu2 %v866_v5  ;;  %v864_v9 = vld [vmem:[%s757_s10] sm:$0xff]  ;;  %s853_s10 = scalar_lea.vmem [#allocation3], %s1417_s25 }
  0x4e   : > { %818 = vmatpush.msra.mxu0 %v793_v4  ;;  %v1539_v10 = vld [vmem:[%s768_s12] ss:$0 sm:$0xff]  ;;  %845 = vmatpush.msra.mxu1 %v826_v18 }
  0x4f   : > { %890 = vmatpush.msra.mxu2 %v865_v6  ;;  %v1540_v13 = vld [vmem:[%s760_s17] ss:$0 sm:$0xff]  ;;  %s2274_s17 = sld [smem:[#allocation36_spill]] (!%p1424_p8) }
  0x50   : > { %819 = vmatpush.msra.mxu0 %v792_v7  ;;  %v824_v22 = vld [vmem:[%s1975_s15] sm:$0xff]  ;;  %846 = vmatpush.msra.mxu1 %v825_v21  ;;  %s2275_s15 = sld [smem:[#allocation38_spill]] (!%p1424_p8) }
  0x51   : > { %1415 = vmatmul.msk.f32.vlgmr.msra.gmra.mxu0 %vm800_vm1, %v791_v8  ;;  %891 = vmatpush.msra.mxu2 %v864_v9  ;;  %v1541_v28 = vld [vmem:[%s776_s0] ss:$0 sm:$0xff]  ;;  %s2272_s0 = sld [smem:[#allocation33_spill]] (!%p1424_p8) }
  0x52   : > { %1419 = vmatmul.msk.f32.vlgmr.msra.gmra.mxu2 %vm800_vm1, %v791_v8  ;;  %847 = vmatpush.msra.mxu1 %v824_v22  ;;  %v972_v32 = vld [vmem:[%s1985_s23] sm:$0xff] }
  0x53   : > { %1416 = vmatmul.msk.f32.vlgmr.msra.gmra.mxu1 %vm800_vm1, %v791_v8  ;;  %991 = vmatpush.msrb.mxu0 %v972_v32  ;;  %v971_v46 = vld [vmem:[#allocation2] sm:$0xff] }
  0xce   : > { %v821_v11 = vpop.f32.mrf.mxu0 }
  0xcf   : > { %v822_v12 = vadd.f32 %v1539_v10, %v821_v11 }
  0xd0   : > { %v849_v29 = vpop.f32.mrf.mxu1 }
  0xd1   : > { %855 = vst.msk [vmem:[%s853_s10] sm:$0xff] %vm854_vm2, %v822_v12  ;;  %v850_v30 = vadd.f32 %v1541_v28, %v849_v29 }
  0xd3   : > { %857 = vst.msk [vmem:[%s856_s24] sm:$0xff] %vm854_vm2, %v850_v30 }
  0xd5   : > { %v893_v14 = vpop.f32.mrf.mxu2 }
  0xd6   : > { %v894_v15 = vadd.f32 %v1540_v13, %v893_v14 }
  0xd8   : > { %v860_v16 = vld [vmem:[%s853_s10] sm:$0xff]  ;;  %s2271_s10 = sld [smem:[#allocation37_spill]] (!%p1424_p8) }
  0xd9   : > { %1420 = vmatpush.xpose.msk.msra.mxu3 %vm854_vm2, %v860_v16 }
  0xda   : > { %v862_v31 = vld [vmem:[%s856_s24] sm:$0xff] }
  0xdc   : > { %1421 = vmatmul.msk.f32.vlgmr.msra.gmra.mxu3 %vm854_vm2, %v894_v15 }
  0xdd   : > { %966 = vmatpush.msrb.mxu3 %v862_v31 }
 0x15f   : > { %v920_v19 = vpop.f32.mrf.mxu3 }
 0x160   : > { %v923_v20 = vsel %vm854_vm2, %v920_v19, -inf }
 0x161   : > { %924 = vmax.xlane.f32.xlu0 %v923_v20 }
 0x1d4   : > { %v925_v23 = vpop.xlane.xlu0 %924 }
 0x1d5   : > { %v926_v24 = vsub.f32 %v920_v19, %v925_v23 }
 0x1d7   : > { %v927_v25 = vmul.f32 1.442695, %v926_v24 }
 0x1d9   : > { %1542 = vpow2.f32 %v927_v25 }
 0x1df   : > { %v1543_v26 = vpop.eup %1542 }
 0x1e0   : > { %v929_v27 = vsel %vm854_vm2, %v1543_v26, 0.0 }
 0x1e1   : > { %930 = vadd.xlane.f32.xlu0 %v929_v27 }
 0x254   : > { %v931_v33 = vpop.xlane.xlu0 %930 }
 0x255   : > { %1544 = vrcp.f32 %v931_v33  ;;  %v943_v37 = vand.u32 2147483648, %v931_v33  ;;  %v941_v39 = vand.u32 2147483647, %v931_v33  ;;  %vm937_vm4 = vweird.f32 %v931_v33 }
 0x257   : > { %v944_v41 = vor.u32 1.1754944e-38, %v943_v37  ;;  %vm942_vm6 = vcmp.eq.f32.partialorder %v941_v39, 8.507059e+37 }
 0x25b   : > { %v1545_v34 = vpop.eup %1544 }
 0x25c   : > { %v933_v35 = vmul.f32 %v1545_v34, %v931_v33  ;;  %vm938_vm3 = vweird.f32 %v1545_v34 }
 0x25d   : > { %vm939_vm5 = vmor %vm937_vm4, %vm938_vm3 }
 0x25e   : > { %v934_v36 = vsub.f32 1.0, %v933_v35 }
 0x260   : > { %v935_v38 = vmul.f32 %v1545_v34, %v934_v36 }
 0x262   : > { %v936_v40 = vadd.f32 %v1545_v34, %v935_v38 }
 0x264   : > { %v940_v42 = vsel %vm939_vm5, %v1545_v34, %v936_v40 }
 0x265   : > { %v945_v43 = vsel %vm942_vm6, %v944_v41, %v940_v42 }
 0x266   : > { %v946_v44 = vmul.f32 %v1543_v26, %v945_v43 }
 0x268   : > { %947 = vst.msk [vmem:[%s741_s21] sm:$0xff] %vm854_vm2, %v946_v44  ;;  %1422 = vmatmul.msk.f32.vlgmr.msrb.gmra.mxu3 %vm854_vm2, %v946_v44 }
 0x2eb   : > { %v968_v45 = vpop.f32.mrf.mxu3 }
 0x2ec   : > { %1423 = vmatmul.msk.f32.vlgmr.msrb.gmra.mxu0 %vm854_vm2, %v968_v45 }
 0x368   : > { %1001 = sbr.rel (%p1424_p8) target bundleno = 1685 (0x695), region = 104 }
 0x369   : > { %v993_v47 = vpop.f32.mrf.mxu0 }
 0x36a   : > { %v996_v48 = vadd.f32 %v993_v47, %v971_v46 }
 0x36c   : > { %997 = vst.msk [vmem:[#allocation2] sm:$0xff] %vm800_vm1, %v996_v48 }
 0x36d   : > { %v1546_v50 = vld [vmem:[%s2190_s9] ss:$0 sm:$0xff]  ;;  %v1712_v55 = vmov 32.0   ;;  %v1052_v3 = vld [vmem:[%s2270_s13 + $0x18] sm:$0xff]  ;;  %v1051_v4 = vld [vmem:[%s2270_s13 + $0x10] sm:$0xff]  ;;  %vm1093_vm11 = vcmask 523264  }
 0x36e   : > { %v1008_v51 = vld [vmem:[%s1955_s20] sm:$0xff]  ;;  %1553 = vrcp.f32 %v1712_v55  ;;  %1072 = vmatpush.msra.mxu0 %v1052_v3  ;;  %v1050_v5 = vld [vmem:[%s2270_s13 + $0x8] sm:$0xff]  ;;  %v1088_v7 = vld [vmem:[%s2271_s10 + $0x38] sm:$0xff] }
 0x36f   : > { %v1049_v6 = vld [vmem:[%s2270_s13] sm:$0xff]  ;;  %v1087_v8 = vld [vmem:[%s2271_s10 + $0x30] sm:$0xff]  ;;  %1105 = vmatpush.msra.mxu1 %v1088_v7  ;;  %v1086_v9 = vld [vmem:[%s2271_s10 + $0x28] sm:$0xff] }
 0x370   : > { %1073 = vmatpush.msra.mxu0 %v1051_v4  ;;  %v1085_v12 = vld [vmem:[%s2271_s10 + $0x20] sm:$0xff]  ;;  %v1084_v14 = vld [vmem:[%s2271_s10 + $0x18] sm:$0xff]  ;;  %v1083_v27 = vld [vmem:[%s2271_s10 + $0x10] sm:$0xff] }
 0x371   : > { %1106 = vmatpush.msra.mxu1 %v1087_v8  ;;  %v1547_v21 = vld [vmem:[%s2272_s0] ss:$0 sm:$0xff]  ;;  %v1082_v28 = vld [vmem:[%s2271_s10 + $0x8] sm:$0xff]  ;;  %s2276_s0 = sld [smem:[#allocation39_spill]] }
 0x372   : > { %1074 = vmatpush.msra.mxu0 %v1050_v5  ;;  %v1548_v24 = vld [vmem:[%s2273_s1] ss:$0 sm:$0xff]  ;;  %s2277_s1 = sld [smem:[#allocation40_spill]] }
 0x373   : > { %v1002_v49 = vld [vmem:[#allocation2] sm:$0xff]  ;;  %1107 = vmatpush.msra.mxu1 %v1086_v9 }
 0x374   : > { %v1007_v52 = vadd.f32 %v1546_v50, %v1002_v49  ;;  %v1554_v56 = vpop.eup %1553  ;;  %1075 = vmatpush.msra.mxu0 %v1049_v6  ;;  %v1081_v29 = vld [vmem:[%s2271_s10] sm:$0xff] }
 0x375   : > { %v1016_v57 = vmul.f32 32.0, %v1554_v56  ;;  %vm1020_vm7 = vweird.f32 %v1554_v56  ;;  %1108 = vmatpush.msra.mxu1 %v1085_v12  ;;  %v1549_v30 = vld [vmem:[%s2274_s17] ss:$0 sm:$0xff] }
 0x376   : > { %v1009_v53 = vadd.f32 %v1008_v51, %v1007_v52  ;;  %v1550_v34 = vld [vmem:[%s2275_s15] ss:$0 sm:$0xff] }
 0x377   : > { %v1017_v58 = vsub.f32 1.0, %v1016_v57  ;;  %1109 = vmatpush.msra.mxu1 %v1084_v14 }
 0x378   : > { %v1012_v54 = vsel %vm800_vm1, %v1009_v53, 0.0  ;;  %v1552_v55 = vld [vmem:[%s2277_s1] ss:$0 sm:$0xff] }
 0x379   : > { %1013 = vadd.xlane.f32.xlu0 %v1012_v54  ;;  %v1018_v59 = vmul.f32 %v1554_v56, %v1017_v58  ;;  %1110 = vmatpush.msra.mxu1 %v1083_v27 }
 0x37b   : > { %v1019_v60 = vadd.f32 %v1554_v56, %v1018_v59  ;;  %1111 = vmatpush.msra.mxu1 %v1082_v28 }
 0x37d   : > { %v2037_v61 = vsel %vm1020_vm7, %v1554_v56, %v1019_v60  ;;  %1112 = vmatpush.msra.mxu1 %v1081_v29 }
 0x3ec   : > { %v1014_v62 = vpop.xlane.xlu0 %1013 }
 0x3ed   : > { %v1022_v63 = vmul.f32 %v2037_v61, %v1014_v62 }
 0x3ef   : > { %v1023_v0 = vsub.f32 %v1009_v53, %v1022_v63  ;;  %v1551_v53 = vld [vmem:[%s2276_s0] ss:$0 sm:$0xff] }
 0x3f1   : > { %v1024_v1 = vmul.f32 %v1023_v0, %v1023_v0 }
 0x3f3   : > { %v1025_v2 = vsel %vm800_vm1, %v1024_v1, 0.0 }
 0x3f4   : > { %1026 = vadd.xlane.f32.xlu0 %v1025_v2 }
 0x467   : > { %v1027_v10 = vpop.xlane.xlu0 %1026 }
 0x468   : > { %v1028_v11 = vmul.f32 %v1027_v10, %v2037_v61 }
 0x46a   : > { %v1029_v13 = vadd.f32 1e-05, %v1028_v11 }
 0x46c   : > { %1555 = vrsqrt.f32 %v1029_v13  ;;  %vm1036_vm9 = vweird.f32 %v1029_v13 }
 0x472   : > { %v1556_v15 = vpop.eup %1555 }
 0x473   : > { %v1031_v16 = vmul.f32 %v1556_v15, %v1029_v13  ;;  %vm1037_vm8 = vweird.f32 %v1556_v15 }
 0x474   : > { %vm1038_vm10 = vmor %vm1036_vm9, %vm1037_vm8 }
 0x475   : > { %v1032_v17 = vmul.f32 %v1556_v15, %v1031_v16 }
 0x477   : > { %v1033_v18 = vmul.f32 0.5, %v1032_v17 }
 0x479   : > { %v1034_v19 = vsub.f32 1.5, %v1033_v18 }
 0x47b   : > { %v1035_v20 = vmul.f32 %v1556_v15, %v1034_v19 }
 0x47d   : > { %v1039_v22 = vsel %vm1038_vm10, %v1556_v15, %v1035_v20 }
 0x47e   : > { %v1040_v23 = vmul.f32 %v1039_v22, %v1023_v0 }
 0x480   : > { %v1044_v25 = vmul.f32 %v1547_v21, %v1040_v23 }
 0x482   : > { %v1048_v26 = vadd.f32 %v1548_v24, %v1044_v25 }
 0x484   : > { %1425 = vmatmul.msk.f32.vlgmr.msra.gmra.mxu0 %vm800_vm1, %v1048_v26 }
 0x501   : > { %v1077_v31 = vpop.f32.mrf.mxu0 }
 0x502   : > { %v1078_v32 = vadd.f32 %v1549_v30, %v1077_v31 }
 0x504   : > { %v1080_v33 = vmax.f32 %v1078_v32, 0.0 }
 0x506   : > { %1426 = vmatmul.msk.f32.vlgmr.msra.gmra.mxu1 %vm1093_vm11, %v1080_v33 }
 0x583   : > { %v1114_v35 = vpop.f32.mrf.mxu1 }
 0x584   : > { %v1115_v36 = vadd.f32 %v1550_v34, %v1114_v35 }
 0x586   : > { %v1117_v37 = vadd.f32 %v1115_v36, %v1048_v26 }
 0x588   : > { %v1120_v38 = vsel %vm800_vm1, %v1117_v37, 0.0 }
 0x589   : > { %1121 = vadd.xlane.f32.xlu1 %v1120_v38 }
 0x5fc   : > { %v1122_v39 = vpop.xlane.xlu1 %1121 }
 0x5fd   : > { %v1123_v40 = vmul.f32 %v1122_v39, %v2037_v61 }
 0x5ff   : > { %v1124_v41 = vsub.f32 %v1117_v37, %v1123_v40 }
 0x601   : > { %v1125_v42 = vmul.f32 %v1124_v41, %v1124_v41 }
 0x603   : > { %v1126_v43 = vsel %vm800_vm1, %v1125_v42, 0.0 }
 0x604   : > { %1127 = vadd.xlane.f32.xlu1 %v1126_v43 }
 0x677   : > { %v1128_v44 = vpop.xlane.xlu1 %1127 }
 0x678   : > { %v1129_v45 = vmul.f32 %v1128_v44, %v2037_v61 }
 0x67a   : > { %v1130_v46 = vadd.f32 1e-05, %v1129_v45 }
 0x67c   : > { %1557 = vrsqrt.f32 %v1130_v46  ;;  %vm1137_vm13 = vweird.f32 %v1130_v46 }
 0x682   : > { %v1558_v47 = vpop.eup %1557 }
 0x683   : > { %v1132_v48 = vmul.f32 %v1558_v47, %v1130_v46  ;;  %vm1138_vm12 = vweird.f32 %v1558_v47 }
 0x684   : > { %vm1139_vm14 = vmor %vm1137_vm13, %vm1138_vm12 }
 0x685   : > { %v1133_v49 = vmul.f32 %v1558_v47, %v1132_v48 }
 0x687   : > { %v1134_v50 = vmul.f32 0.5, %v1133_v49 }
 0x689   : > { %v1135_v51 = vsub.f32 1.5, %v1134_v50 }
 0x68b   : > { %v1136_v52 = vmul.f32 %v1558_v47, %v1135_v51 }
 0x68d   : > { %v1140_v54 = vsel %vm1139_vm14, %v1558_v47, %v1136_v52 }
 0x68e   : > { %v1141_v56 = vmul.f32 %v1140_v54, %v1124_v41 }
 0x690   : > { %v1145_v57 = vmul.f32 %v1551_v53, %v1141_v56 }
 0x692   : > { %v1149_v58 = vadd.f32 %v1552_v55, %v1145_v57 }
 0x694   : > { %1150 = vst.msk [vmem:[%s734_s14] sm:$0xff] %vm800_vm1, %v1149_v58 }
 0x695 PF: > { %s2278_s23 = sld [smem:[#allocation17_spill]]  ;;  %s1170_s24 = sshll.u32 %s734_s14, 4  ;;  %s1171_s24 = int_to_ptr.vmem [resolvable:$true] %s1170_s24 }
 0x696   : > { %s2279_s11 = sld [smem:[#allocation15_spill]] }
 0x697   : > { %s2281_s22 = sld [smem:[#allocation41_spill]] }
 0x69b   : > { %s1429_s25 = sshll.u32 %s2278_s23, 3 }
 0x69c   : > { %s2283_s15 = sand.u32 1, %s2279_s11  }
 0x69d   : > { %s2282_s12 = smov %s2281_s22  ;;  %s1168_s17 = scalar_lea.hbm %s2281_s22, %s1429_s25 }
 0x69e   : > { %s1172_s26 = sshll.u32 %s1168_s17, 4  ;;  %s1152_s20 = scalar_lea.sflag [#allocation6], %s2283_s15  ;;  %s1173_s26 = int_to_ptr.hbm [resolvable:$true] %s1172_s26 }
 0x69f   : > { %s1573_s27 = sshra.s32 %s1173_s26, 4  ;;  %s1579_s1 = scalar_lea.hbm %s2282_s12, 16  ;;  %s1574_s27 = int_to_ptr.hbm [resolvable:$true] %s1573_s27 }
 0x6a0   : > { %s1575_s0 = scalar_lea.hbm %s1574_s27, 8  ;;  %p1580_p0 = scmp.lt.s32.totalorder %s1574_s27, %s2282_s12 }
 0x6a1   : > { %p1576_p9 = scmp.ne.s32.totalorder %s1574_s27, %s1575_s0  ;;  %p1581_p1 = scmp.lt.s32.totalorder %s1579_s1, %s1575_s0 }
 0x6a3   : > { %p1577_p10 = pnand %p1576_p9, %p1884_p3  ;;  %p1582_p4 = por %p1581_p1, %p1580_p0 }
 0x6a5   : > { %p1578_p11 = pneg %p1577_p10 }
 0x6a7   : > { %p1583_p2 = pnand %p1582_p4, %p1578_p11 }
 0x6a9   : > { %1586 = shalt.err (!%p1583_p2)
}
 0x6aa   : > { %s2284_s18 = sld [smem:[#allocation12_spill]]  ;;  %s1430_s11 = sshll.u32 %s2278_s23, 2 }
 0x6ab   : > { %1437 = dma.vmem_to_hbm [thread:$0]  (%p1884_p3), %s1171_s24, 128, %s1173_s26, %s1152_s20  }
 0x6ac   : > { %s1187_s16 = sshll.u32 %s741_s21, 4  ;;  %s1183_s22 = sadd.s32 %s1693_s2, %s1430_s11  ;;  %s1188_s16 = int_to_ptr.vmem [resolvable:$true] %s1187_s16 }
 0x6ad   : > { %s1431_s17 = sshll.u32 %s1183_s22, 3  ;;  %s2286_s27 = sld [smem:[#allocation42_spill]] }
 0x6b0   : > { %s2287_s1 = sand.u32 1, %s2284_s18  }
 0x6b1   : > { %s1157_s29 = scalar_lea.sflag [#allocation8], %s2287_s1 }
 0x6b3   : > { %s1185_s0 = scalar_lea.hbm %s2286_s27, %s1431_s17  ;;  %s1607_s2 = scalar_lea.hbm %s2286_s27, 64 }
 0x6b4   : > { %s1189_s30 = sshll.u32 %s1185_s0, 4  ;;  %s1190_s30 = int_to_ptr.hbm [resolvable:$true] %s1189_s30 }
 0x6b5   : > { %s1601_s28 = sshra.s32 %s1190_s30, 4  ;;  %s1602_s28 = int_to_ptr.hbm [resolvable:$true] %s1601_s28 }
 0x6b6   : > { %s1603_s25 = scalar_lea.hbm %s1602_s28, 8  ;;  %p1608_p8 = scmp.lt.s32.totalorder %s1602_s28, %s2286_s27 }
 0x6b7   : > { %p1604_p5 = scmp.ne.s32.totalorder %s1602_s28, %s1603_s25  ;;  %p1609_p9 = scmp.lt.s32.totalorder %s1607_s2, %s1603_s25 }
 0x6b9   : > { %p1605_p3 = pnand %p1604_p5, %p1913_p12  ;;  %p1610_p10 = por %p1609_p9, %p1608_p8 }
 0x6bb   : > { %p1606_p6 = pneg %p1605_p3 }
 0x6bd   : > { %p1611_p11 = pnand %p1610_p10, %p1606_p6 }
 0x6bf   : > { %1614 = shalt.err (!%p1611_p11)
}
 0x6c0   : > { %1438 = dma.vmem_to_hbm [thread:$0]  (%p1913_p12), %s1188_s16, 128, %s1190_s30, %s1157_s29  }
 0x6c1 PF: > { %s2288_s26 = sld [smem:[#allocation20_spill]] }
 0x6c2   : > { %s2289_s20 = sld [smem:[#allocation14_spill]] }
 0x6c7   : > { %p1448_p0 = scmp.ge.s32.totalorder %s2288_s26, 2 }
 0x6c8   : > { %s1201_s11 = sand.u32 1, %s2289_s20  }
 0x6c9   : > { %p1442_p1 = pnand %p1448_p0, %p1901_p7  ;;  %s1202_s22 = scalar_lea.sflag [#allocation6], %s1201_s11 }
 0x6cb   : > { %p1443_p4 = pneg %p1442_p1 }
 0x6cd   : > { %1660 = dma.done.wait (%p1443_p4), %s1202_s22, 128  }
 0x6ce   : > { %1662 = vsyncadd (%p1443_p4), %s1202_s22, 4294967168  ;;  %s2291_s17 = sld [smem:[#allocation11_spill]]  ;;  %p1445_p2 = pnand %p1448_p0, %p1925_p13 }
 0x6d0   : > { %p1446_p5 = pneg %p1445_p2 }
 0x6d4   : > { %s1211_s3 = sand.u32 1, %s2291_s17  }
 0x6d5   : > { %s1212_s14 = scalar_lea.sflag [#allocation8], %s1211_s3 }
 0x6d6   : > { %1664 = dma.done.wait (%p1446_p5), %s1212_s14, 128  }
 0x6d7   : > { %1666 = vsyncadd (%p1446_p5), %s1212_s14, 4294967168  ;;  %s36_s3 = sadd.s32 1, %s2288_s26   ;;  %s2293_s0 = sld [smem:[#allocation12_spill]] }
 0x6d8   : > { %p33_p12 = scmp.ge.s32.totalorder %s36_s3, 10   ;;  %s2294_s30 = sld [smem:[#allocation13_spill]] }
 0x6d9   : > { %s2295_s20 = sld [smem:[#allocation27_spill]] }
 0x6da   : > { %s2296_s21 = sld [smem:[#allocation15_spill]] }
 0x6db   : > { %s2297_s1 = sld [smem:[#allocation16_spill]] }
 0x6dc   : > { %s2298_s22 = sld [smem:[#allocation26_spill]]  ;;  %35 = sbr.rel (!%p33_p12) target bundleno = 24 (0x18), region = 184 }
 0x6dd   : > { %s2299_s2 = sld [smem:[#allocation18_spill]] }
 0x6de   : > { %s2300_s23 = sld [smem:[#allocation19_spill]] }
 0x6df   : > { %s2301_s24 = sld [smem:[#allocation21_spill]] }
 0x6e0   : > { %s2302_s25 = sld [smem:[#allocation23_spill]] }
 0x6e1   :  { %1218 = vsyncpa [#allocation6], 1 }
 0x6e2   :  { %1220 = vsyncpa [#allocation6 + $0x1], 1 }
 0x6e3   :  { %1221 = vsyncpa [#allocation8], 1 }
 0x6e4   :  { %1223 = vsyncpa [#allocation8 + $0x1], 1 }

</bundles_post_ra>
